<compile_context>
chip_gen: v6e
topology: v6e:2x2x1
jax: 0.10.0
libtpu: 0.0.40
codegen_flags: <defaults>
</compile_context>

<pallas_src>
import math
import numpy as np
import jax
import jax.numpy as jnp
from jax.experimental import pallas as pl
from jax.experimental.pallas import tpu as pltpu

# ----------------------- small ViT-MAE config --------------------------------
BATCH = 2
IN_CH = 3
IMG = 16
PATCH = 4
GRID = IMG // PATCH                 # 4
NUM_PATCHES = GRID * GRID           # 16
CPP = IN_CH * PATCH * PATCH         # 48
HIDDEN = 32
HEADS = 4
HEAD_DIM = HIDDEN // HEADS          # 8
LAYERS = 2
MLP = 4 * HIDDEN                    # 128
MASK_RATIO = 0.75
LEN_KEEP = int(NUM_PATCHES * (1.0 - MASK_RATIO))   # 4 visible patches
SEQ = LEN_KEEP + 1                                  # +CLS -> 5
EPS = 1e-12                                         # ViT layer_norm_eps
SCALE = 1.0 / math.sqrt(HEAD_DIM)
INV_SQRT2 = 1.0 / math.sqrt(2.0)


# ----------------------------- Pallas kernel ----------------------------------
def _layernorm(v, g, b):
    mu = jnp.mean(v, axis=-1, keepdims=True)
    var = jnp.mean((v - mu) ** 2, axis=-1, keepdims=True)
    return (v - mu) * jax.lax.rsqrt(var + EPS) * g + b


def mae_fused_kernel(xk_ref, pos_ref, pw_ref, gv_ref,
                     wqkv_ref, bqkv_ref, wo_ref, w1_ref, b1_ref, w2_ref, vec_ref,
                     o_ref, hs_ref):
    # gv_ref rows: 0 patch_b, 1 cls+pos[0], 2 final ln_g, 3 final ln_b
    # vec_ref[l] rows: 0 ln1_g, 1 ln1_b, 2 bo, 3 ln2_g, 4 ln2_b, 5 b2

    # ---- patch embedding (+bias +pos) for the kept patches --------------------
    emb = (jnp.dot(xk_ref[...], pw_ref[...], preferred_element_type=jnp.float32)
           + gv_ref[0:1, :] + pos_ref[...])                       # (B*LK, D)

    cls_row = gv_ref[1:2, :]                                      # (1, D)
    for b in range(BATCH):                                        # static, B=2
        hs_ref[b * SEQ: b * SEQ + 1, :] = cls_row
        hs_ref[b * SEQ + 1:(b + 1) * SEQ, :] = emb[b * LEN_KEEP:(b + 1) * LEN_KEEP, :]

    # ---- transformer encoder blocks (pre-LN) ----------------------------------
    for l in range(LAYERS):                                       # static unroll
        lv = vec_ref[l]                                           # (6, D)
        x = hs_ref[...]                                           # (B*S, D)
        xn = _layernorm(x, lv[0:1, :], lv[1:2, :])

        wqkv = wqkv_ref[l]                                        # (H, D, 3*HD)
        bqkv = bqkv_ref[l]                                        # (H, 1, 3*HD)
        wo = wo_ref[l]                                            # (H, HD, D)

        for b in range(BATCH):                                    # static, B=2
            rows = slice(b * SEQ, (b + 1) * SEQ)
            # head-batched projections: one 3D einsum (batch dim = HEADS)
            xnb = jnp.broadcast_to(xn[rows][None], (HEADS, SEQ, HIDDEN))
            qkv = jnp.einsum('hsd,hde->hse', xnb, wqkv,
                             preferred_element_type=jnp.float32) + bqkv
            q = qkv[:, :, 0:HEAD_DIM]
            k = qkv[:, :, HEAD_DIM:2 * HEAD_DIM]
            v = qkv[:, :, 2 * HEAD_DIM:3 * HEAD_DIM]

            s = jnp.einsum('hqe,hke->hqk', q, k,
                           preferred_element_type=jnp.float32) * SCALE
            s = s - jnp.max(s, axis=-1, keepdims=True)
            p = jnp.exp(s)
            p = p * pl.reciprocal(jnp.sum(p, axis=-1, keepdims=True), approx=True)

            o = jnp.einsum('hqk,hke->hqe', p, v,
                           preferred_element_type=jnp.float32)    # (H, S, HD)
            proj = jnp.einsum('hse,hed->hsd', o, wo,
                              preferred_element_type=jnp.float32) # (H, S, D)
            attn_b = jnp.sum(proj, axis=0) + lv[2:3, :]           # (S, D)
            hs_ref[rows, :] = x[rows] + attn_b                    # residual 1

        x2 = hs_ref[...]
        xn2 = _layernorm(x2, lv[3:4, :], lv[4:5, :])
        hdn = jnp.dot(xn2, w1_ref[l],
                      preferred_element_type=jnp.float32) + b1_ref[l]
        # exact GELU (erf), matching HF 'gelu' activation
        hdn = 0.5 * hdn * (1.0 + jax.lax.erf(hdn * INV_SQRT2))
        mlp = jnp.dot(hdn, w2_ref[l],
                      preferred_element_type=jnp.float32) + lv[5:6, :]
        hs_ref[...] = x2 + mlp                                    # residual 2

    # ---- final LayerNorm + mean over sequence ---------------------------------
    normed = _layernorm(hs_ref[...], gv_ref[2:3, :], gv_ref[3:4, :])
    for b in range(BATCH):
        o_ref[b:b + 1, :] = jnp.mean(normed[b * SEQ:(b + 1) * SEQ, :],
                                     axis=0, keepdims=True)


def mae_fused(xk_flat, pos_flat, p):
    args = (xk_flat, pos_flat, p["patch_w"], p["gvecs"],
            p["wqkv"], p["bqkv"], p["wo"], p["w1"], p["b1"], p["w2"], p["vecs"])
    return pl.pallas_call(
        mae_fused_kernel,
        in_specs=[pl.BlockSpec(memory_space=pltpu.MemorySpace.VMEM)] * len(args),
        out_specs=pl.BlockSpec(memory_space=pltpu.MemorySpace.VMEM),
        out_shape=jax.ShapeDtypeStruct((BATCH, HIDDEN), jnp.float32),
        scratch_shapes=[pltpu.VMEM((BATCH * SEQ, HIDDEN), jnp.float32)],
    )(*args)


# ------------------------- fixed sin-cos pos-embed -----------------------------
def _get_1d_sincos(embed_dim, pos):
    omega = np.arange(embed_dim // 2, dtype=np.float64) / (embed_dim / 2.0)
    omega = 1.0 / 10000 ** omega
    out = np.einsum("m,d->md", pos.reshape(-1), omega)
    return np.concatenate([np.sin(out), np.cos(out)], axis=1)


def get_2d_sincos_pos_embed(embed_dim, grid_size):
    grid_h = np.arange(grid_size, dtype=np.float64)
    grid_w = np.arange(grid_size, dtype=np.float64)
    grid = np.meshgrid(grid_w, grid_h)               # w goes first (MAE convention)
    grid = np.stack(grid, axis=0)
    emb_h = _get_1d_sincos(embed_dim // 2, grid[0])
    emb_w = _get_1d_sincos(embed_dim // 2, grid[1])
    pos = np.concatenate([emb_h, emb_w], axis=1)
    pos = np.concatenate([np.zeros([1, embed_dim]), pos], axis=0)  # CLS slot
    return jnp.asarray(pos[None], dtype=jnp.float32)               # (1, Np+1, D)


# ------------------------------ params ----------------------------------------
def init_params(key):
    ks = jax.random.split(key, 3 + LAYERS)
    std = 0.02

    def nrm(k, shape):
        return std * jax.random.normal(k, shape, jnp.float32)

    params = {
        "patch_w": nrm(ks[0], (CPP, HIDDEN)),
        "patch_b": jnp.zeros((1, HIDDEN), jnp.float32),
        "cls": nrm(ks[1], (1, 1, HIDDEN)),
        "pos_embed": get_2d_sincos_pos_embed(HIDDEN, GRID),
        "ln_g": jnp.ones((1, HIDDEN), jnp.float32),
        "ln_b": jnp.zeros((1, HIDDEN), jnp.float32),
        "layers": [],
    }
    for l in range(LAYERS):
        lk = jax.random.split(ks[3 + l], 6)
        params["layers"].append({
            "ln1_g": jnp.ones((1, HIDDEN), jnp.float32),
            "ln1_b": jnp.zeros((1, HIDDEN), jnp.float32),
            "wq": nrm(lk[0], (HIDDEN, HIDDEN)), "bq": jnp.zeros((1, HIDDEN), jnp.float32),
            "wk": nrm(lk[1], (HIDDEN, HIDDEN)), "bk": jnp.zeros((1, HIDDEN), jnp.float32),
            "wv": nrm(lk[2], (HIDDEN, HIDDEN)), "bv": jnp.zeros((1, HIDDEN), jnp.float32),
            "wo": nrm(lk[3], (HIDDEN, HIDDEN)), "bo": jnp.zeros((1, HIDDEN), jnp.float32),
            "ln2_g": jnp.ones((1, HIDDEN), jnp.float32),
            "ln2_b": jnp.zeros((1, HIDDEN), jnp.float32),
            "w1": nrm(lk[4], (HIDDEN, MLP)), "b1": jnp.zeros((1, MLP), jnp.float32),
            "w2": nrm(lk[5], (MLP, HIDDEN)), "b2": jnp.zeros((1, HIDDEN), jnp.float32),
        })
    return params


def pack_params(params):
    """Repack logical per-layer params into a few slab operands (done once)."""
    pos = params["pos_embed"]                                     # (1, Np+1, D)
    gvecs = jnp.concatenate([
        params["patch_b"],                                        # patch bias
        params["cls"][0] + pos[0, 0:1, :],                        # cls + pos[0]
        params["ln_g"], params["ln_b"]], axis=0)                  # (4, D)

    def per_head_w(w):   # (D, D) -> (HEADS, D, HD)
        return w.reshape(HIDDEN, HEADS, HEAD_DIM).transpose(1, 0, 2)

    def per_head_b(b):   # (1, D) -> (HEADS, 1, HD)
        return b.reshape(HEADS, HEAD_DIM)[:, None, :]

    wqkv_l, bqkv_l, wo_l, w1_l, b1_l, w2_l, vec_l = [], [], [], [], [], [], []
    for lp in params["layers"]:
        wqkv_l.append(jnp.concatenate(
            [per_head_w(lp["wq"]), per_head_w(lp["wk"]), per_head_w(lp["wv"])],
            axis=-1))                                             # (H, D, 3*HD)
        bqkv_l.append(jnp.concatenate(
            [per_head_b(lp["bq"]), per_head_b(lp["bk"]), per_head_b(lp["bv"])],
            axis=-1))                                             # (H, 1, 3*HD)
        wo_l.append(lp["wo"].reshape(HEADS, HEAD_DIM, HIDDEN))    # (H, HD, D)
        w1_l.append(lp["w1"])
        b1_l.append(lp["b1"])
        w2_l.append(lp["w2"])
        vec_l.append(jnp.concatenate(
            [lp["ln1_g"], lp["ln1_b"], lp["bo"],
             lp["ln2_g"], lp["ln2_b"], lp["b2"]], axis=0))        # (6, D)

    return {
        "patch_w": params["patch_w"],
        "gvecs": gvecs,
        "pos_patch": pos[0, 1:, :],                               # (Np, D)
        "wqkv": jnp.stack(wqkv_l), "bqkv": jnp.stack(bqkv_l),
        "wo": jnp.stack(wo_l),
        "w1": jnp.stack(w1_l), "b1": jnp.stack(b1_l), "w2": jnp.stack(w2_l),
        "vecs": jnp.stack(vec_l),
    }


# ------------------------------ forward ----------------------------------------
def mae_backbone_forward(x, packed, noise_key):
    B = x.shape[0]
    assert B == BATCH
    # patchify NCHW -> [B, Np, C*P*P] with (c, i, j) flatten order, matching the
    # Conv2d weight layout [D, C, P, P].reshape(D, -1).T
    xp = x.reshape(B, IN_CH, GRID, PATCH, GRID, PATCH)
    xp = xp.transpose(0, 2, 4, 1, 3, 5).reshape(B, NUM_PATCHES, CPP)

    # ViT-MAE random masking (deterministic noise); argsort/gather is JAX glue.
    noise = jax.random.uniform(noise_key, (B, NUM_PATCHES))
    ids_shuffle = jnp.argsort(noise, axis=1)
    ids_keep = ids_shuffle[:, :LEN_KEEP]

    # Gather kept raw patches + their pos embeddings.  The patch projection is a
    # per-patch linear map, so gathering before projection == projecting then
    # gathering (as HF does); projection itself is fused into the kernel.
    xk = jnp.take_along_axis(xp, ids_keep[:, :, None], axis=1)    # (B, LK, CPP)
    pos_k = jnp.take(packed["pos_patch"], ids_keep, axis=0)       # (B, LK, D)

    xk_flat = xk.reshape(B * LEN_KEEP, CPP)
    pos_flat = pos_k.reshape(B * LEN_KEEP, HIDDEN)

    # single fused kernel: patch-embed -> CLS prepend -> LAYERS blocks ->
    # final LayerNorm -> mean over sequence (== torch.mean(last_hidden_state, 1))
    return mae_fused(xk_flat, pos_flat, packed)


if __name__ == "__main__":
    root = jax.random.PRNGKey(0)
    k_param, k_input, k_noise = jax.random.split(root, 3)

    params = init_params(k_param)
    packed = pack_params(params)
    x = jax.random.normal(k_input, (BATCH, IN_CH, IMG, IMG), jnp.float32)

    feats = mae_backbone_forward(x, packed, k_noise)
    feats = jax.block_until_ready(feats)
    assert feats.shape == (BATCH, HIDDEN) and feats.dtype == jnp.float32
    assert bool(jnp.all(jnp.isfinite(feats)))
    print("KERNEL_OK")
</pallas_src>

<mosaic_0001>
module attributes {stable_mosaic.version = 11 : i64} {
  func.func @mae_fused_kernel(%arg0: memref<8x48xf32, #tpu.memory_space<vmem>>, %arg1: memref<8x32xf32, #tpu.memory_space<vmem>>, %arg2: memref<48x32xf32, #tpu.memory_space<vmem>>, %arg3: memref<4x32xf32, #tpu.memory_space<vmem>>, %arg4: memref<2x4x32x24xf32, #tpu.memory_space<vmem>>, %arg5: memref<2x4x1x24xf32, #tpu.memory_space<vmem>>, %arg6: memref<2x4x8x32xf32, #tpu.memory_space<vmem>>, %arg7: memref<2x32x128xf32, #tpu.memory_space<vmem>>, %arg8: memref<2x1x128xf32, #tpu.memory_space<vmem>>, %arg9: memref<2x128x32xf32, #tpu.memory_space<vmem>>, %arg10: memref<2x6x32xf32, #tpu.memory_space<vmem>>, %arg11: memref<2x32xf32, #tpu.memory_space<vmem>>, %arg12: memref<10x32xf32, #tpu.memory_space<vmem>>) attributes {dimension_semantics = [], scalar_prefetch = 0 : i64, scratch_operands = 1 : i64, tpu.core_type = #tpu.core_type<tc>} {
    %c0 = arith.constant 0 : index
    %c0_0 = arith.constant 0 : index
    %0 = vector.load %arg0[%c0, %c0_0] : memref<8x48xf32, #tpu.memory_space<vmem>>, vector<8x48xf32>
    %c0_1 = arith.constant 0 : index
    %c0_2 = arith.constant 0 : index
    %1 = vector.load %arg2[%c0_1, %c0_2] : memref<48x32xf32, #tpu.memory_space<vmem>>, vector<48x32xf32>
    %cst = arith.constant dense<0.000000e+00> : vector<8x32xf32>
    %2 = tpu.matmul %0, %1, %cst {dimension_numbers = #tpu.dot_dimension_numbers<[1], [0], [0], [1], [0, 0, 1, 1], [], []>} : vector<8x48xf32>, vector<48x32xf32>, vector<8x32xf32> -> vector<8x32xf32>
    %c0_3 = arith.constant 0 : index
    %c0_4 = arith.constant 0 : index
    %3 = vector.load %arg3[%c0_3, %c0_4] : memref<4x32xf32, #tpu.memory_space<vmem>>, vector<1x32xf32>
    %4 = vector.broadcast %3 : vector<1x32xf32> to vector<8x32xf32>
    %5 = arith.addf %2, %4 : vector<8x32xf32>
    %c0_5 = arith.constant 0 : index
    %c0_6 = arith.constant 0 : index
    %6 = vector.load %arg1[%c0_5, %c0_6] : memref<8x32xf32, #tpu.memory_space<vmem>>, vector<8x32xf32>
    %7 = arith.addf %5, %6 : vector<8x32xf32>
    %c1 = arith.constant 1 : index
    %c0_7 = arith.constant 0 : index
    %8 = vector.load %arg3[%c1, %c0_7] : memref<4x32xf32, #tpu.memory_space<vmem>>, vector<1x32xf32>
    %c0_8 = arith.constant 0 : index
    %c0_9 = arith.constant 0 : index
    %9 = vector.load %arg12[%c0_8, %c0_9] : memref<10x32xf32, #tpu.memory_space<vmem>>, vector<1x32xf32>
    tpu.vector_store %arg12[%c0_8, %c0_9], %8 {strides = array<i32>} : memref<10x32xf32, #tpu.memory_space<vmem>>, vector<1x32xf32>,
    %10 = vector.extract_strided_slice %7 {offsets = [0, 0], sizes = [4, 32], strides = [1, 1]} : vector<8x32xf32> to vector<4x32xf32>
    %c1_10 = arith.constant 1 : index
    %c0_11 = arith.constant 0 : index
    %11 = vector.load %arg12[%c1_10, %c0_11] : memref<10x32xf32, #tpu.memory_space<vmem>>, vector<4x32xf32>
    tpu.vector_store %arg12[%c1_10, %c0_11], %10 {strides = array<i32>} : memref<10x32xf32, #tpu.memory_space<vmem>>, vector<4x32xf32>,
    %c5 = arith.constant 5 : index
    %c0_12 = arith.constant 0 : index
    %12 = vector.load %arg12[%c5, %c0_12] : memref<10x32xf32, #tpu.memory_space<vmem>>, vector<1x32xf32>
    tpu.vector_store %arg12[%c5, %c0_12], %8 {strides = array<i32>} : memref<10x32xf32, #tpu.memory_space<vmem>>, vector<1x32xf32>,
    %13 = vector.extract_strided_slice %7 {offsets = [4, 0], sizes = [4, 32], strides = [1, 1]} : vector<8x32xf32> to vector<4x32xf32>
    %c6 = arith.constant 6 : index
    %c0_13 = arith.constant 0 : index
    %14 = vector.load %arg12[%c6, %c0_13] : memref<10x32xf32, #tpu.memory_space<vmem>>, vector<4x32xf32>
    tpu.vector_store %arg12[%c6, %c0_13], %13 {strides = array<i32>} : memref<10x32xf32, #tpu.memory_space<vmem>>, vector<4x32xf32>,
    %c0_14 = arith.constant 0 : index
    %c0_15 = arith.constant 0 : index
    %c0_16 = arith.constant 0 : index
    %15 = vector.load %arg10[%c0_14, %c0_15, %c0_16] : memref<2x6x32xf32, #tpu.memory_space<vmem>>, vector<1x6x32xf32>
    %16 = vector.shape_cast %15 : vector<1x6x32xf32> to vector<6x32xf32>
    %c0_17 = arith.constant 0 : index
    %c0_18 = arith.constant 0 : index
    %17 = vector.load %arg12[%c0_17, %c0_18] : memref<10x32xf32, #tpu.memory_space<vmem>>, vector<10x32xf32>
    %18 = vector.extract_strided_slice %16 {offsets = [0, 0], sizes = [1, 32], strides = [1, 1]} : vector<6x32xf32> to vector<1x32xf32>
    %19 = vector.extract_strided_slice %16 {offsets = [1, 0], sizes = [1, 32], strides = [1, 1]} : vector<6x32xf32> to vector<1x32xf32>
    %cst_19 = arith.constant dense<0.000000e+00> : vector<10xf32>
    %20 = vector.multi_reduction <add>, %17, %cst_19 [1] : vector<10x32xf32> to vector<10xf32>
    %21 = vector.shape_cast %20 : vector<10xf32> to vector<10x1xf32>
    %cst_20 = arith.constant 3.200000e+01 : f32
    %22 = vector.broadcast %cst_20 : f32 to vector<10x1xf32>
    %23 = arith.divf %21, %22 : vector<10x1xf32>
    %24 = vector.broadcast %23 : vector<10x1xf32> to vector<10x32xf32>
    %25 = arith.subf %17, %24 : vector<10x32xf32>
    %26 = arith.mulf %25, %25 : vector<10x32xf32>
    %cst_21 = arith.constant dense<0.000000e+00> : vector<10xf32>
    %27 = vector.multi_reduction <add>, %26, %cst_21 [1] : vector<10x32xf32> to vector<10xf32>
    %28 = vector.shape_cast %27 : vector<10xf32> to vector<10x1xf32>
    %cst_22 = arith.constant 3.200000e+01 : f32
    %29 = vector.broadcast %cst_22 : f32 to vector<10x1xf32>
    %30 = arith.divf %28, %29 : vector<10x1xf32>
    %31 = vector.broadcast %23 : vector<10x1xf32> to vector<10x32xf32>
    %32 = arith.subf %17, %31 : vector<10x32xf32>
    %cst_23 = arith.constant 9.99999996E-13 : f32
    %33 = vector.broadcast %cst_23 : f32 to vector<10x1xf32>
    %34 = arith.addf %30, %33 : vector<10x1xf32>
    %35 = math.rsqrt %34 : vector<10x1xf32>
    %36 = vector.broadcast %35 : vector<10x1xf32> to vector<10x32xf32>
    %37 = arith.mulf %32, %36 : vector<10x32xf32>
    %38 = vector.broadcast %18 : vector<1x32xf32> to vector<10x32xf32>
    %39 = arith.mulf %37, %38 : vector<10x32xf32>
    %40 = vector.broadcast %19 : vector<1x32xf32> to vector<10x32xf32>
    %41 = arith.addf %39, %40 : vector<10x32xf32>
    %c0_24 = arith.constant 0 : index
    %c0_25 = arith.constant 0 : index
    %c0_26 = arith.constant 0 : index
    %c0_27 = arith.constant 0 : index
    %42 = vector.load %arg4[%c0_24, %c0_25, %c0_26, %c0_27] : memref<2x4x32x24xf32, #tpu.memory_space<vmem>>, vector<1x4x32x24xf32>
    %43 = vector.shape_cast %42 : vector<1x4x32x24xf32> to vector<4x32x24xf32>
    %c0_28 = arith.constant 0 : index
    %c0_29 = arith.constant 0 : index
    %c0_30 = arith.constant 0 : index
    %c0_31 = arith.constant 0 : index
    %44 = vector.load %arg5[%c0_28, %c0_29, %c0_30, %c0_31] : memref<2x4x1x24xf32, #tpu.memory_space<vmem>>, vector<1x4x1x24xf32>
    %45 = vector.shape_cast %44 : vector<1x4x1x24xf32> to vector<4x1x24xf32>
    %c0_32 = arith.constant 0 : index
    %c0_33 = arith.constant 0 : index
    %c0_34 = arith.constant 0 : index
    %c0_35 = arith.constant 0 : index
    %46 = vector.load %arg6[%c0_32, %c0_33, %c0_34, %c0_35] : memref<2x4x8x32xf32, #tpu.memory_space<vmem>>, vector<1x4x8x32xf32>
    %47 = vector.shape_cast %46 : vector<1x4x8x32xf32> to vector<4x8x32xf32>
    %48 = vector.extract_strided_slice %41 {offsets = [0, 0], sizes = [5, 32], strides = [1, 1]} : vector<10x32xf32> to vector<5x32xf32>
    %49 = vector.shape_cast %48 : vector<5x32xf32> to vector<1x5x32xf32>
    %50 = vector.shape_cast %49 : vector<1x5x32xf32> to vector<1x5x32xf32>
    %51 = vector.broadcast %50 : vector<1x5x32xf32> to vector<4x5x32xf32>
    "tpu.trace_start"() <{level = 10 : i32, message = "hsd,hde->hse"}> : () -> ()
    %cst_36 = arith.constant dense<0.000000e+00> : vector<4x5x24xf32>
    %52 = tpu.matmul %51, %43, %cst_36 {dimension_numbers = #tpu.dot_dimension_numbers<[2], [1], [1], [2], [0, 0, 0, 1, 1, 2], [0], [0]>} : vector<4x5x32xf32>, vector<4x32x24xf32>, vector<4x5x24xf32> -> vector<4x5x24xf32>
    "tpu.trace_stop"() : () -> ()
    %53 = vector.broadcast %45 : vector<4x1x24xf32> to vector<4x5x24xf32>
    %54 = arith.addf %52, %53 : vector<4x5x24xf32>
    %55 = vector.extract_strided_slice %54 {offsets = [0, 0, 0], sizes = [4, 5, 8], strides = [1, 1, 1]} : vector<4x5x24xf32> to vector<4x5x8xf32>
    %56 = vector.extract_strided_slice %54 {offsets = [0, 0, 8], sizes = [4, 5, 8], strides = [1, 1, 1]} : vector<4x5x24xf32> to vector<4x5x8xf32>
    %57 = vector.extract_strided_slice %54 {offsets = [0, 0, 16], sizes = [4, 5, 8], strides = [1, 1, 1]} : vector<4x5x24xf32> to vector<4x5x8xf32>
    "tpu.trace_start"() <{level = 10 : i32, message = "hqe,hke->hqk"}> : () -> ()
    %cst_37 = arith.constant dense<0.000000e+00> : vector<4x5x5xf32>
    %58 = tpu.matmul %55, %56, %cst_37 {dimension_numbers = #tpu.dot_dimension_numbers<[2], [2], [1], [1], [0, 0, 0, 1, 1, 1], [0], [0]>} : vector<4x5x8xf32>, vector<4x5x8xf32>, vector<4x5x5xf32> -> vector<4x5x5xf32>
    "tpu.trace_stop"() : () -> ()
    %cst_38 = arith.constant 0.353553385 : f32
    %59 = vector.broadcast %cst_38 : f32 to vector<4x5x5xf32>
    %60 = arith.mulf %58, %59 : vector<4x5x5xf32>
    %cst_39 = arith.constant dense<0xFF800000> : vector<4x5xf32>
    %61 = vector.multi_reduction <maximumf>, %60, %cst_39 [2] : vector<4x5x5xf32> to vector<4x5xf32>
    %62 = vector.shape_cast %61 : vector<4x5xf32> to vector<4x5x1xf32>
    %63 = vector.broadcast %62 : vector<4x5x1xf32> to vector<4x5x5xf32>
    %64 = arith.subf %60, %63 : vector<4x5x5xf32>
    %65 = math.exp %64 : vector<4x5x5xf32>
    %cst_40 = arith.constant dense<0.000000e+00> : vector<4x5xf32>
    %66 = vector.multi_reduction <add>, %65, %cst_40 [2] : vector<4x5x5xf32> to vector<4x5xf32>
    %67 = vector.shape_cast %66 : vector<4x5xf32> to vector<4x5x1xf32>
    %68 = tpu.reciprocal %67 {approx = true} : vector<4x5x1xf32> -> vector<4x5x1xf32>
    %69 = vector.broadcast %68 : vector<4x5x1xf32> to vector<4x5x5xf32>
    %70 = arith.mulf %65, %69 : vector<4x5x5xf32>
    "tpu.trace_start"() <{level = 10 : i32, message = "hqk,hke->hqe"}> : () -> ()
    %cst_41 = arith.constant dense<0.000000e+00> : vector<4x5x8xf32>
    %71 = tpu.matmul %70, %57, %cst_41 {dimension_numbers = #tpu.dot_dimension_numbers<[2], [1], [1], [2], [0, 0, 0, 1, 1, 2], [0], [0]>} : vector<4x5x5xf32>, vector<4x5x8xf32>, vector<4x5x8xf32> -> vector<4x5x8xf32>
    "tpu.trace_stop"() : () -> ()
    "tpu.trace_start"() <{level = 10 : i32, message = "hse,hed->hsd"}> : () -> ()
    %cst_42 = arith.constant dense<0.000000e+00> : vector<4x5x32xf32>
    %72 = tpu.matmul %71, %47, %cst_42 {dimension_numbers = #tpu.dot_dimension_numbers<[2], [1], [1], [2], [0, 0, 0, 1, 1, 2], [0], [0]>} : vector<4x5x8xf32>, vector<4x8x32xf32>, vector<4x5x32xf32> -> vector<4x5x32xf32>
    "tpu.trace_stop"() : () -> ()
    %cst_43 = arith.constant dense<0.000000e+00> : vector<5x32xf32>
    %73 = vector.multi_reduction <add>, %72, %cst_43 [0] : vector<4x5x32xf32> to vector<5x32xf32>
    %74 = vector.extract_strided_slice %16 {offsets = [2, 0], sizes = [1, 32], strides = [1, 1]} : vector<6x32xf32> to vector<1x32xf32>
    %75 = vector.broadcast %74 : vector<1x32xf32> to vector<5x32xf32>
    %76 = arith.addf %73, %75 : vector<5x32xf32>
    %77 = vector.extract_strided_slice %17 {offsets = [0, 0], sizes = [5, 32], strides = [1, 1]} : vector<10x32xf32> to vector<5x32xf32>
    %78 = arith.addf %77, %76 : vector<5x32xf32>
    %c0_44 = arith.constant 0 : index
    %c0_45 = arith.constant 0 : index
    %79 = vector.load %arg12[%c0_44, %c0_45] : memref<10x32xf32, #tpu.memory_space<vmem>>, vector<5x32xf32>
    tpu.vector_store %arg12[%c0_44, %c0_45], %78 {strides = array<i32>} : memref<10x32xf32, #tpu.memory_space<vmem>>, vector<5x32xf32>,
    %80 = vector.extract_strided_slice %41 {offsets = [5, 0], sizes = [5, 32], strides = [1, 1]} : vector<10x32xf32> to vector<5x32xf32>
    %81 = vector.shape_cast %80 : vector<5x32xf32> to vector<1x5x32xf32>
    %82 = vector.shape_cast %81 : vector<1x5x32xf32> to vector<1x5x32xf32>
    %83 = vector.broadcast %82 : vector<1x5x32xf32> to vector<4x5x32xf32>
    "tpu.trace_start"() <{level = 10 : i32, message = "hsd,hde->hse"}> : () -> ()
    %cst_46 = arith.constant dense<0.000000e+00> : vector<4x5x24xf32>
    %84 = tpu.matmul %83, %43, %cst_46 {dimension_numbers = #tpu.dot_dimension_numbers<[2], [1], [1], [2], [0, 0, 0, 1, 1, 2], [0], [0]>} : vector<4x5x32xf32>, vector<4x32x24xf32>, vector<4x5x24xf32> -> vector<4x5x24xf32>
    "tpu.trace_stop"() : () -> ()
    %85 = vector.broadcast %45 : vector<4x1x24xf32> to vector<4x5x24xf32>
    %86 = arith.addf %84, %85 : vector<4x5x24xf32>
    %87 = vector.extract_strided_slice %86 {offsets = [0, 0, 0], sizes = [4, 5, 8], strides = [1, 1, 1]} : vector<4x5x24xf32> to vector<4x5x8xf32>
    %88 = vector.extract_strided_slice %86 {offsets = [0, 0, 8], sizes = [4, 5, 8], strides = [1, 1, 1]} : vector<4x5x24xf32> to vector<4x5x8xf32>
    %89 = vector.extract_strided_slice %86 {offsets = [0, 0, 16], sizes = [4, 5, 8], strides = [1, 1, 1]} : vector<4x5x24xf32> to vector<4x5x8xf32>
    "tpu.trace_start"() <{level = 10 : i32, message = "hqe,hke->hqk"}> : () -> ()
    %cst_47 = arith.constant dense<0.000000e+00> : vector<4x5x5xf32>
    %90 = tpu.matmul %87, %88, %cst_47 {dimension_numbers = #tpu.dot_dimension_numbers<[2], [2], [1], [1], [0, 0, 0, 1, 1, 1], [0], [0]>} : vector<4x5x8xf32>, vector<4x5x8xf32>, vector<4x5x5xf32> -> vector<4x5x5xf32>
    "tpu.trace_stop"() : () -> ()
    %cst_48 = arith.constant 0.353553385 : f32
    %91 = vector.broadcast %cst_48 : f32 to vector<4x5x5xf32>
    %92 = arith.mulf %90, %91 : vector<4x5x5xf32>
    %cst_49 = arith.constant dense<0xFF800000> : vector<4x5xf32>
    %93 = vector.multi_reduction <maximumf>, %92, %cst_49 [2] : vector<4x5x5xf32> to vector<4x5xf32>
    %94 = vector.shape_cast %93 : vector<4x5xf32> to vector<4x5x1xf32>
    %95 = vector.broadcast %94 : vector<4x5x1xf32> to vector<4x5x5xf32>
    %96 = arith.subf %92, %95 : vector<4x5x5xf32>
    %97 = math.exp %96 : vector<4x5x5xf32>
    %cst_50 = arith.constant dense<0.000000e+00> : vector<4x5xf32>
    %98 = vector.multi_reduction <add>, %97, %cst_50 [2] : vector<4x5x5xf32> to vector<4x5xf32>
    %99 = vector.shape_cast %98 : vector<4x5xf32> to vector<4x5x1xf32>
    %100 = tpu.reciprocal %99 {approx = true} : vector<4x5x1xf32> -> vector<4x5x1xf32>
    %101 = vector.broadcast %100 : vector<4x5x1xf32> to vector<4x5x5xf32>
    %102 = arith.mulf %97, %101 : vector<4x5x5xf32>
    "tpu.trace_start"() <{level = 10 : i32, message = "hqk,hke->hqe"}> : () -> ()
    %cst_51 = arith.constant dense<0.000000e+00> : vector<4x5x8xf32>
    %103 = tpu.matmul %102, %89, %cst_51 {dimension_numbers = #tpu.dot_dimension_numbers<[2], [1], [1], [2], [0, 0, 0, 1, 1, 2], [0], [0]>} : vector<4x5x5xf32>, vector<4x5x8xf32>, vector<4x5x8xf32> -> vector<4x5x8xf32>
    "tpu.trace_stop"() : () -> ()
    "tpu.trace_start"() <{level = 10 : i32, message = "hse,hed->hsd"}> : () -> ()
    %cst_52 = arith.constant dense<0.000000e+00> : vector<4x5x32xf32>
    %104 = tpu.matmul %103, %47, %cst_52 {dimension_numbers = #tpu.dot_dimension_numbers<[2], [1], [1], [2], [0, 0, 0, 1, 1, 2], [0], [0]>} : vector<4x5x8xf32>, vector<4x8x32xf32>, vector<4x5x32xf32> -> vector<4x5x32xf32>
    "tpu.trace_stop"() : () -> ()
    %cst_53 = arith.constant dense<0.000000e+00> : vector<5x32xf32>
    %105 = vector.multi_reduction <add>, %104, %cst_53 [0] : vector<4x5x32xf32> to vector<5x32xf32>
    %106 = vector.extract_strided_slice %16 {offsets = [2, 0], sizes = [1, 32], strides = [1, 1]} : vector<6x32xf32> to vector<1x32xf32>
    %107 = vector.broadcast %106 : vector<1x32xf32> to vector<5x32xf32>
    %108 = arith.addf %105, %107 : vector<5x32xf32>
    %109 = vector.extract_strided_slice %17 {offsets = [5, 0], sizes = [5, 32], strides = [1, 1]} : vector<10x32xf32> to vector<5x32xf32>
    %110 = arith.addf %109, %108 : vector<5x32xf32>
    %c5_54 = arith.constant 5 : index
    %c0_55 = arith.constant 0 : index
    %111 = vector.load %arg12[%c5_54, %c0_55] : memref<10x32xf32, #tpu.memory_space<vmem>>, vector<5x32xf32>
    tpu.vector_store %arg12[%c5_54, %c0_55], %110 {strides = array<i32>} : memref<10x32xf32, #tpu.memory_space<vmem>>, vector<5x32xf32>,
    %c0_56 = arith.constant 0 : index
    %c0_57 = arith.constant 0 : index
    %112 = vector.load %arg12[%c0_56, %c0_57] : memref<10x32xf32, #tpu.memory_space<vmem>>, vector<10x32xf32>
    %113 = vector.extract_strided_slice %16 {offsets = [3, 0], sizes = [1, 32], strides = [1, 1]} : vector<6x32xf32> to vector<1x32xf32>
    %114 = vector.extract_strided_slice %16 {offsets = [4, 0], sizes = [1, 32], strides = [1, 1]} : vector<6x32xf32> to vector<1x32xf32>
    %cst_58 = arith.constant dense<0.000000e+00> : vector<10xf32>
    %115 = vector.multi_reduction <add>, %112, %cst_58 [1] : vector<10x32xf32> to vector<10xf32>
    %116 = vector.shape_cast %115 : vector<10xf32> to vector<10x1xf32>
    %cst_59 = arith.constant 3.200000e+01 : f32
    %117 = vector.broadcast %cst_59 : f32 to vector<10x1xf32>
    %118 = arith.divf %116, %117 : vector<10x1xf32>
    %119 = vector.broadcast %118 : vector<10x1xf32> to vector<10x32xf32>
    %120 = arith.subf %112, %119 : vector<10x32xf32>
    %121 = arith.mulf %120, %120 : vector<10x32xf32>
    %cst_60 = arith.constant dense<0.000000e+00> : vector<10xf32>
    %122 = vector.multi_reduction <add>, %121, %cst_60 [1] : vector<10x32xf32> to vector<10xf32>
    %123 = vector.shape_cast %122 : vector<10xf32> to vector<10x1xf32>
    %cst_61 = arith.constant 3.200000e+01 : f32
    %124 = vector.broadcast %cst_61 : f32 to vector<10x1xf32>
    %125 = arith.divf %123, %124 : vector<10x1xf32>
    %126 = vector.broadcast %118 : vector<10x1xf32> to vector<10x32xf32>
    %127 = arith.subf %112, %126 : vector<10x32xf32>
    %cst_62 = arith.constant 9.99999996E-13 : f32
    %128 = vector.broadcast %cst_62 : f32 to vector<10x1xf32>
    %129 = arith.addf %125, %128 : vector<10x1xf32>
    %130 = math.rsqrt %129 : vector<10x1xf32>
    %131 = vector.broadcast %130 : vector<10x1xf32> to vector<10x32xf32>
    %132 = arith.mulf %127, %131 : vector<10x32xf32>
    %133 = vector.broadcast %113 : vector<1x32xf32> to vector<10x32xf32>
    %134 = arith.mulf %132, %133 : vector<10x32xf32>
    %135 = vector.broadcast %114 : vector<1x32xf32> to vector<10x32xf32>
    %136 = arith.addf %134, %135 : vector<10x32xf32>
    %c0_63 = arith.constant 0 : index
    %c0_64 = arith.constant 0 : index
    %c0_65 = arith.constant 0 : index
    %137 = vector.load %arg7[%c0_63, %c0_64, %c0_65] : memref<2x32x128xf32, #tpu.memory_space<vmem>>, vector<1x32x128xf32>
    %138 = vector.shape_cast %137 : vector<1x32x128xf32> to vector<32x128xf32>
    %cst_66 = arith.constant dense<0.000000e+00> : vector<10x128xf32>
    %139 = tpu.matmul %136, %138, %cst_66 {dimension_numbers = #tpu.dot_dimension_numbers<[1], [0], [0], [1], [0, 0, 1, 1], [], []>} : vector<10x32xf32>, vector<32x128xf32>, vector<10x128xf32> -> vector<10x128xf32>
    %c0_67 = arith.constant 0 : index
    %c0_68 = arith.constant 0 : index
    %c0_69 = arith.constant 0 : index
    %140 = vector.load %arg8[%c0_67, %c0_68, %c0_69] : memref<2x1x128xf32, #tpu.memory_space<vmem>>, vector<1x1x128xf32>
    %141 = vector.shape_cast %140 : vector<1x1x128xf32> to vector<1x128xf32>
    %142 = vector.broadcast %141 : vector<1x128xf32> to vector<10x128xf32>
    %143 = arith.addf %139, %142 : vector<10x128xf32>
    %cst_70 = arith.constant 5.000000e-01 : f32
    %144 = vector.broadcast %cst_70 : f32 to vector<10x128xf32>
    %145 = arith.mulf %144, %143 : vector<10x128xf32>
    %cst_71 = arith.constant 0.707106769 : f32
    %146 = vector.broadcast %cst_71 : f32 to vector<10x128xf32>
    %147 = arith.mulf %143, %146 : vector<10x128xf32>
    %148 = math.erf %147 : vector<10x128xf32>
    %cst_72 = arith.constant 1.000000e+00 : f32
    %149 = vector.broadcast %cst_72 : f32 to vector<10x128xf32>
    %150 = arith.addf %149, %148 : vector<10x128xf32>
    %151 = arith.mulf %145, %150 : vector<10x128xf32>
    %c0_73 = arith.constant 0 : index
    %c0_74 = arith.constant 0 : index
    %c0_75 = arith.constant 0 : index
    %152 = vector.load %arg9[%c0_73, %c0_74, %c0_75] : memref<2x128x32xf32, #tpu.memory_space<vmem>>, vector<1x128x32xf32>
    %153 = vector.shape_cast %152 : vector<1x128x32xf32> to vector<128x32xf32>
    %cst_76 = arith.constant dense<0.000000e+00> : vector<10x32xf32>
    %154 = tpu.matmul %151, %153, %cst_76 {dimension_numbers = #tpu.dot_dimension_numbers<[1], [0], [0], [1], [0, 0, 1, 1], [], []>} : vector<10x128xf32>, vector<128x32xf32>, vector<10x32xf32> -> vector<10x32xf32>
    %155 = vector.extract_strided_slice %16 {offsets = [5, 0], sizes = [1, 32], strides = [1, 1]} : vector<6x32xf32> to vector<1x32xf32>
    %156 = vector.broadcast %155 : vector<1x32xf32> to vector<10x32xf32>
    %157 = arith.addf %154, %156 : vector<10x32xf32>
    %158 = arith.addf %112, %157 : vector<10x32xf32>
    %c0_77 = arith.constant 0 : index
    %c0_78 = arith.constant 0 : index
    %159 = vector.load %arg12[%c0_77, %c0_78] : memref<10x32xf32, #tpu.memory_space<vmem>>, vector<10x32xf32>
    tpu.vector_store %arg12[%c0_77, %c0_78], %158 {strides = array<i32>} : memref<10x32xf32, #tpu.memory_space<vmem>>, vector<10x32xf32>,
    %c1_79 = arith.constant 1 : index
    %c0_80 = arith.constant 0 : index
    %c0_81 = arith.constant 0 : index
    %160 = vector.load %arg10[%c1_79, %c0_80, %c0_81] : memref<2x6x32xf32, #tpu.memory_space<vmem>>, vector<1x6x32xf32>
    %161 = vector.shape_cast %160 : vector<1x6x32xf32> to vector<6x32xf32>
    %c0_82 = arith.constant 0 : index
    %c0_83 = arith.constant 0 : index
    %162 = vector.load %arg12[%c0_82, %c0_83] : memref<10x32xf32, #tpu.memory_space<vmem>>, vector<10x32xf32>
    %163 = vector.extract_strided_slice %161 {offsets = [0, 0], sizes = [1, 32], strides = [1, 1]} : vector<6x32xf32> to vector<1x32xf32>
    %164 = vector.extract_strided_slice %161 {offsets = [1, 0], sizes = [1, 32], strides = [1, 1]} : vector<6x32xf32> to vector<1x32xf32>
    %cst_84 = arith.constant dense<0.000000e+00> : vector<10xf32>
    %165 = vector.multi_reduction <add>, %162, %cst_84 [1] : vector<10x32xf32> to vector<10xf32>
    %166 = vector.shape_cast %165 : vector<10xf32> to vector<10x1xf32>
    %cst_85 = arith.constant 3.200000e+01 : f32
    %167 = vector.broadcast %cst_85 : f32 to vector<10x1xf32>
    %168 = arith.divf %166, %167 : vector<10x1xf32>
    %169 = vector.broadcast %168 : vector<10x1xf32> to vector<10x32xf32>
    %170 = arith.subf %162, %169 : vector<10x32xf32>
    %171 = arith.mulf %170, %170 : vector<10x32xf32>
    %cst_86 = arith.constant dense<0.000000e+00> : vector<10xf32>
    %172 = vector.multi_reduction <add>, %171, %cst_86 [1] : vector<10x32xf32> to vector<10xf32>
    %173 = vector.shape_cast %172 : vector<10xf32> to vector<10x1xf32>
    %cst_87 = arith.constant 3.200000e+01 : f32
    %174 = vector.broadcast %cst_87 : f32 to vector<10x1xf32>
    %175 = arith.divf %173, %174 : vector<10x1xf32>
    %176 = vector.broadcast %168 : vector<10x1xf32> to vector<10x32xf32>
    %177 = arith.subf %162, %176 : vector<10x32xf32>
    %cst_88 = arith.constant 9.99999996E-13 : f32
    %178 = vector.broadcast %cst_88 : f32 to vector<10x1xf32>
    %179 = arith.addf %175, %178 : vector<10x1xf32>
    %180 = math.rsqrt %179 : vector<10x1xf32>
    %181 = vector.broadcast %180 : vector<10x1xf32> to vector<10x32xf32>
    %182 = arith.mulf %177, %181 : vector<10x32xf32>
    %183 = vector.broadcast %163 : vector<1x32xf32> to vector<10x32xf32>
    %184 = arith.mulf %182, %183 : vector<10x32xf32>
    %185 = vector.broadcast %164 : vector<1x32xf32> to vector<10x32xf32>
    %186 = arith.addf %184, %185 : vector<10x32xf32>
    %c1_89 = arith.constant 1 : index
    %c0_90 = arith.constant 0 : index
    %c0_91 = arith.constant 0 : index
    %c0_92 = arith.constant 0 : index
    %187 = vector.load %arg4[%c1_89, %c0_90, %c0_91, %c0_92] : memref<2x4x32x24xf32, #tpu.memory_space<vmem>>, vector<1x4x32x24xf32>
    %188 = vector.shape_cast %187 : vector<1x4x32x24xf32> to vector<4x32x24xf32>
    %c1_93 = arith.constant 1 : index
    %c0_94 = arith.constant 0 : index
    %c0_95 = arith.constant 0 : index
    %c0_96 = arith.constant 0 : index
    %189 = vector.load %arg5[%c1_93, %c0_94, %c0_95, %c0_96] : memref<2x4x1x24xf32, #tpu.memory_space<vmem>>, vector<1x4x1x24xf32>
    %190 = vector.shape_cast %189 : vector<1x4x1x24xf32> to vector<4x1x24xf32>
    %c1_97 = arith.constant 1 : index
    %c0_98 = arith.constant 0 : index
    %c0_99 = arith.constant 0 : index
    %c0_100 = arith.constant 0 : index
    %191 = vector.load %arg6[%c1_97, %c0_98, %c0_99, %c0_100] : memref<2x4x8x32xf32, #tpu.memory_space<vmem>>, vector<1x4x8x32xf32>
    %192 = vector.shape_cast %191 : vector<1x4x8x32xf32> to vector<4x8x32xf32>
    %193 = vector.extract_strided_slice %186 {offsets = [0, 0], sizes = [5, 32], strides = [1, 1]} : vector<10x32xf32> to vector<5x32xf32>
    %194 = vector.shape_cast %193 : vector<5x32xf32> to vector<1x5x32xf32>
    %195 = vector.shape_cast %194 : vector<1x5x32xf32> to vector<1x5x32xf32>
    %196 = vector.broadcast %195 : vector<1x5x32xf32> to vector<4x5x32xf32>
    "tpu.trace_start"() <{level = 10 : i32, message = "hsd,hde->hse"}> : () -> ()
    %cst_101 = arith.constant dense<0.000000e+00> : vector<4x5x24xf32>
    %197 = tpu.matmul %196, %188, %cst_101 {dimension_numbers = #tpu.dot_dimension_numbers<[2], [1], [1], [2], [0, 0, 0, 1, 1, 2], [0], [0]>} : vector<4x5x32xf32>, vector<4x32x24xf32>, vector<4x5x24xf32> -> vector<4x5x24xf32>
    "tpu.trace_stop"() : () -> ()
    %198 = vector.broadcast %190 : vector<4x1x24xf32> to vector<4x5x24xf32>
    %199 = arith.addf %197, %198 : vector<4x5x24xf32>
    %200 = vector.extract_strided_slice %199 {offsets = [0, 0, 0], sizes = [4, 5, 8], strides = [1, 1, 1]} : vector<4x5x24xf32> to vector<4x5x8xf32>
    %201 = vector.extract_strided_slice %199 {offsets = [0, 0, 8], sizes = [4, 5, 8], strides = [1, 1, 1]} : vector<4x5x24xf32> to vector<4x5x8xf32>
    %202 = vector.extract_strided_slice %199 {offsets = [0, 0, 16], sizes = [4, 5, 8], strides = [1, 1, 1]} : vector<4x5x24xf32> to vector<4x5x8xf32>
    "tpu.trace_start"() <{level = 10 : i32, message = "hqe,hke->hqk"}> : () -> ()
    %cst_102 = arith.constant dense<0.000000e+00> : vector<4x5x5xf32>
    %203 = tpu.matmul %200, %201, %cst_102 {dimension_numbers = #tpu.dot_dimension_numbers<[2], [2], [1], [1], [0, 0, 0, 1, 1, 1], [0], [0]>} : vector<4x5x8xf32>, vector<4x5x8xf32>, vector<4x5x5xf32> -> vector<4x5x5xf32>
    "tpu.trace_stop"() : () -> ()
    %cst_103 = arith.constant 0.353553385 : f32
    %204 = vector.broadcast %cst_103 : f32 to vector<4x5x5xf32>
    %205 = arith.mulf %203, %204 : vector<4x5x5xf32>
    %cst_104 = arith.constant dense<0xFF800000> : vector<4x5xf32>
    %206 = vector.multi_reduction <maximumf>, %205, %cst_104 [2] : vector<4x5x5xf32> to vector<4x5xf32>
    %207 = vector.shape_cast %206 : vector<4x5xf32> to vector<4x5x1xf32>
    %208 = vector.broadcast %207 : vector<4x5x1xf32> to vector<4x5x5xf32>
    %209 = arith.subf %205, %208 : vector<4x5x5xf32>
    %210 = math.exp %209 : vector<4x5x5xf32>
    %cst_105 = arith.constant dense<0.000000e+00> : vector<4x5xf32>
    %211 = vector.multi_reduction <add>, %210, %cst_105 [2] : vector<4x5x5xf32> to vector<4x5xf32>
    %212 = vector.shape_cast %211 : vector<4x5xf32> to vector<4x5x1xf32>
    %213 = tpu.reciprocal %212 {approx = true} : vector<4x5x1xf32> -> vector<4x5x1xf32>
    %214 = vector.broadcast %213 : vector<4x5x1xf32> to vector<4x5x5xf32>
    %215 = arith.mulf %210, %214 : vector<4x5x5xf32>
    "tpu.trace_start"() <{level = 10 : i32, message = "hqk,hke->hqe"}> : () -> ()
    %cst_106 = arith.constant dense<0.000000e+00> : vector<4x5x8xf32>
    %216 = tpu.matmul %215, %202, %cst_106 {dimension_numbers = #tpu.dot_dimension_numbers<[2], [1], [1], [2], [0, 0, 0, 1, 1, 2], [0], [0]>} : vector<4x5x5xf32>, vector<4x5x8xf32>, vector<4x5x8xf32> -> vector<4x5x8xf32>
    "tpu.trace_stop"() : () -> ()
    "tpu.trace_start"() <{level = 10 : i32, message = "hse,hed->hsd"}> : () -> ()
    %cst_107 = arith.constant dense<0.000000e+00> : vector<4x5x32xf32>
    %217 = tpu.matmul %216, %192, %cst_107 {dimension_numbers = #tpu.dot_dimension_numbers<[2], [1], [1], [2], [0, 0, 0, 1, 1, 2], [0], [0]>} : vector<4x5x8xf32>, vector<4x8x32xf32>, vector<4x5x32xf32> -> vector<4x5x32xf32>
    "tpu.trace_stop"() : () -> ()
    %cst_108 = arith.constant dense<0.000000e+00> : vector<5x32xf32>
    %218 = vector.multi_reduction <add>, %217, %cst_108 [0] : vector<4x5x32xf32> to vector<5x32xf32>
    %219 = vector.extract_strided_slice %161 {offsets = [2, 0], sizes = [1, 32], strides = [1, 1]} : vector<6x32xf32> to vector<1x32xf32>
    %220 = vector.broadcast %219 : vector<1x32xf32> to vector<5x32xf32>
    %221 = arith.addf %218, %220 : vector<5x32xf32>
    %222 = vector.extract_strided_slice %162 {offsets = [0, 0], sizes = [5, 32], strides = [1, 1]} : vector<10x32xf32> to vector<5x32xf32>
    %223 = arith.addf %222, %221 : vector<5x32xf32>
    %c0_109 = arith.constant 0 : index
    %c0_110 = arith.constant 0 : index
    %224 = vector.load %arg12[%c0_109, %c0_110] : memref<10x32xf32, #tpu.memory_space<vmem>>, vector<5x32xf32>
    tpu.vector_store %arg12[%c0_109, %c0_110], %223 {strides = array<i32>} : memref<10x32xf32, #tpu.memory_space<vmem>>, vector<5x32xf32>,
    %225 = vector.extract_strided_slice %186 {offsets = [5, 0], sizes = [5, 32], strides = [1, 1]} : vector<10x32xf32> to vector<5x32xf32>
    %226 = vector.shape_cast %225 : vector<5x32xf32> to vector<1x5x32xf32>
    %227 = vector.shape_cast %226 : vector<1x5x32xf32> to vector<1x5x32xf32>
    %228 = vector.broadcast %227 : vector<1x5x32xf32> to vector<4x5x32xf32>
    "tpu.trace_start"() <{level = 10 : i32, message = "hsd,hde->hse"}> : () -> ()
    %cst_111 = arith.constant dense<0.000000e+00> : vector<4x5x24xf32>
    %229 = tpu.matmul %228, %188, %cst_111 {dimension_numbers = #tpu.dot_dimension_numbers<[2], [1], [1], [2], [0, 0, 0, 1, 1, 2], [0], [0]>} : vector<4x5x32xf32>, vector<4x32x24xf32>, vector<4x5x24xf32> -> vector<4x5x24xf32>
    "tpu.trace_stop"() : () -> ()
    %230 = vector.broadcast %190 : vector<4x1x24xf32> to vector<4x5x24xf32>
    %231 = arith.addf %229, %230 : vector<4x5x24xf32>
    %232 = vector.extract_strided_slice %231 {offsets = [0, 0, 0], sizes = [4, 5, 8], strides = [1, 1, 1]} : vector<4x5x24xf32> to vector<4x5x8xf32>
    %233 = vector.extract_strided_slice %231 {offsets = [0, 0, 8], sizes = [4, 5, 8], strides = [1, 1, 1]} : vector<4x5x24xf32> to vector<4x5x8xf32>
    %234 = vector.extract_strided_slice %231 {offsets = [0, 0, 16], sizes = [4, 5, 8], strides = [1, 1, 1]} : vector<4x5x24xf32> to vector<4x5x8xf32>
    "tpu.trace_start"() <{level = 10 : i32, message = "hqe,hke->hqk"}> : () -> ()
    %cst_112 = arith.constant dense<0.000000e+00> : vector<4x5x5xf32>
    %235 = tpu.matmul %232, %233, %cst_112 {dimension_numbers = #tpu.dot_dimension_numbers<[2], [2], [1], [1], [0, 0, 0, 1, 1, 1], [0], [0]>} : vector<4x5x8xf32>, vector<4x5x8xf32>, vector<4x5x5xf32> -> vector<4x5x5xf32>
    "tpu.trace_stop"() : () -> ()
    %cst_113 = arith.constant 0.353553385 : f32
    %236 = vector.broadcast %cst_113 : f32 to vector<4x5x5xf32>
    %237 = arith.mulf %235, %236 : vector<4x5x5xf32>
    %cst_114 = arith.constant dense<0xFF800000> : vector<4x5xf32>
    %238 = vector.multi_reduction <maximumf>, %237, %cst_114 [2] : vector<4x5x5xf32> to vector<4x5xf32>
    %239 = vector.shape_cast %238 : vector<4x5xf32> to vector<4x5x1xf32>
    %240 = vector.broadcast %239 : vector<4x5x1xf32> to vector<4x5x5xf32>
    %241 = arith.subf %237, %240 : vector<4x5x5xf32>
    %242 = math.exp %241 : vector<4x5x5xf32>
    %cst_115 = arith.constant dense<0.000000e+00> : vector<4x5xf32>
    %243 = vector.multi_reduction <add>, %242, %cst_115 [2] : vector<4x5x5xf32> to vector<4x5xf32>
    %244 = vector.shape_cast %243 : vector<4x5xf32> to vector<4x5x1xf32>
    %245 = tpu.reciprocal %244 {approx = true} : vector<4x5x1xf32> -> vector<4x5x1xf32>
    %246 = vector.broadcast %245 : vector<4x5x1xf32> to vector<4x5x5xf32>
    %247 = arith.mulf %242, %246 : vector<4x5x5xf32>
    "tpu.trace_start"() <{level = 10 : i32, message = "hqk,hke->hqe"}> : () -> ()
    %cst_116 = arith.constant dense<0.000000e+00> : vector<4x5x8xf32>
    %248 = tpu.matmul %247, %234, %cst_116 {dimension_numbers = #tpu.dot_dimension_numbers<[2], [1], [1], [2], [0, 0, 0, 1, 1, 2], [0], [0]>} : vector<4x5x5xf32>, vector<4x5x8xf32>, vector<4x5x8xf32> -> vector<4x5x8xf32>
    "tpu.trace_stop"() : () -> ()
    "tpu.trace_start"() <{level = 10 : i32, message = "hse,hed->hsd"}> : () -> ()
    %cst_117 = arith.constant dense<0.000000e+00> : vector<4x5x32xf32>
    %249 = tpu.matmul %248, %192, %cst_117 {dimension_numbers = #tpu.dot_dimension_numbers<[2], [1], [1], [2], [0, 0, 0, 1, 1, 2], [0], [0]>} : vector<4x5x8xf32>, vector<4x8x32xf32>, vector<4x5x32xf32> -> vector<4x5x32xf32>
    "tpu.trace_stop"() : () -> ()
    %cst_118 = arith.constant dense<0.000000e+00> : vector<5x32xf32>
    %250 = vector.multi_reduction <add>, %249, %cst_118 [0] : vector<4x5x32xf32> to vector<5x32xf32>
    %251 = vector.extract_strided_slice %161 {offsets = [2, 0], sizes = [1, 32], strides = [1, 1]} : vector<6x32xf32> to vector<1x32xf32>
    %252 = vector.broadcast %251 : vector<1x32xf32> to vector<5x32xf32>
    %253 = arith.addf %250, %252 : vector<5x32xf32>
    %254 = vector.extract_strided_slice %162 {offsets = [5, 0], sizes = [5, 32], strides = [1, 1]} : vector<10x32xf32> to vector<5x32xf32>
    %255 = arith.addf %254, %253 : vector<5x32xf32>
    %c5_119 = arith.constant 5 : index
    %c0_120 = arith.constant 0 : index
    %256 = vector.load %arg12[%c5_119, %c0_120] : memref<10x32xf32, #tpu.memory_space<vmem>>, vector<5x32xf32>
    tpu.vector_store %arg12[%c5_119, %c0_120], %255 {strides = array<i32>} : memref<10x32xf32, #tpu.memory_space<vmem>>, vector<5x32xf32>,
    %c0_121 = arith.constant 0 : index
    %c0_122 = arith.constant 0 : index
    %257 = vector.load %arg12[%c0_121, %c0_122] : memref<10x32xf32, #tpu.memory_space<vmem>>, vector<10x32xf32>
    %258 = vector.extract_strided_slice %161 {offsets = [3, 0], sizes = [1, 32], strides = [1, 1]} : vector<6x32xf32> to vector<1x32xf32>
    %259 = vector.extract_strided_slice %161 {offsets = [4, 0], sizes = [1, 32], strides = [1, 1]} : vector<6x32xf32> to vector<1x32xf32>
    %cst_123 = arith.constant dense<0.000000e+00> : vector<10xf32>
    %260 = vector.multi_reduction <add>, %257, %cst_123 [1] : vector<10x32xf32> to vector<10xf32>
    %261 = vector.shape_cast %260 : vector<10xf32> to vector<10x1xf32>
    %cst_124 = arith.constant 3.200000e+01 : f32
    %262 = vector.broadcast %cst_124 : f32 to vector<10x1xf32>
    %263 = arith.divf %261, %262 : vector<10x1xf32>
    %264 = vector.broadcast %263 : vector<10x1xf32> to vector<10x32xf32>
    %265 = arith.subf %257, %264 : vector<10x32xf32>
    %266 = arith.mulf %265, %265 : vector<10x32xf32>
    %cst_125 = arith.constant dense<0.000000e+00> : vector<10xf32>
    %267 = vector.multi_reduction <add>, %266, %cst_125 [1] : vector<10x32xf32> to vector<10xf32>
    %268 = vector.shape_cast %267 : vector<10xf32> to vector<10x1xf32>
    %cst_126 = arith.constant 3.200000e+01 : f32
    %269 = vector.broadcast %cst_126 : f32 to vector<10x1xf32>
    %270 = arith.divf %268, %269 : vector<10x1xf32>
    %271 = vector.broadcast %263 : vector<10x1xf32> to vector<10x32xf32>
    %272 = arith.subf %257, %271 : vector<10x32xf32>
    %cst_127 = arith.constant 9.99999996E-13 : f32
    %273 = vector.broadcast %cst_127 : f32 to vector<10x1xf32>
    %274 = arith.addf %270, %273 : vector<10x1xf32>
    %275 = math.rsqrt %274 : vector<10x1xf32>
    %276 = vector.broadcast %275 : vector<10x1xf32> to vector<10x32xf32>
    %277 = arith.mulf %272, %276 : vector<10x32xf32>
    %278 = vector.broadcast %258 : vector<1x32xf32> to vector<10x32xf32>
    %279 = arith.mulf %277, %278 : vector<10x32xf32>
    %280 = vector.broadcast %259 : vector<1x32xf32> to vector<10x32xf32>
    %281 = arith.addf %279, %280 : vector<10x32xf32>
    %c1_128 = arith.constant 1 : index
    %c0_129 = arith.constant 0 : index
    %c0_130 = arith.constant 0 : index
    %282 = vector.load %arg7[%c1_128, %c0_129, %c0_130] : memref<2x32x128xf32, #tpu.memory_space<vmem>>, vector<1x32x128xf32>
    %283 = vector.shape_cast %282 : vector<1x32x128xf32> to vector<32x128xf32>
    %cst_131 = arith.constant dense<0.000000e+00> : vector<10x128xf32>
    %284 = tpu.matmul %281, %283, %cst_131 {dimension_numbers = #tpu.dot_dimension_numbers<[1], [0], [0], [1], [0, 0, 1, 1], [], []>} : vector<10x32xf32>, vector<32x128xf32>, vector<10x128xf32> -> vector<10x128xf32>
    %c1_132 = arith.constant 1 : index
    %c0_133 = arith.constant 0 : index
    %c0_134 = arith.constant 0 : index
    %285 = vector.load %arg8[%c1_132, %c0_133, %c0_134] : memref<2x1x128xf32, #tpu.memory_space<vmem>>, vector<1x1x128xf32>
    %286 = vector.shape_cast %285 : vector<1x1x128xf32> to vector<1x128xf32>
    %287 = vector.broadcast %286 : vector<1x128xf32> to vector<10x128xf32>
    %288 = arith.addf %284, %287 : vector<10x128xf32>
    %cst_135 = arith.constant 5.000000e-01 : f32
    %289 = vector.broadcast %cst_135 : f32 to vector<10x128xf32>
    %290 = arith.mulf %289, %288 : vector<10x128xf32>
    %cst_136 = arith.constant 0.707106769 : f32
    %291 = vector.broadcast %cst_136 : f32 to vector<10x128xf32>
    %292 = arith.mulf %288, %291 : vector<10x128xf32>
    %293 = math.erf %292 : vector<10x128xf32>
    %cst_137 = arith.constant 1.000000e+00 : f32
    %294 = vector.broadcast %cst_137 : f32 to vector<10x128xf32>
    %295 = arith.addf %294, %293 : vector<10x128xf32>
    %296 = arith.mulf %290, %295 : vector<10x128xf32>
    %c1_138 = arith.constant 1 : index
    %c0_139 = arith.constant 0 : index
    %c0_140 = arith.constant 0 : index
    %297 = vector.load %arg9[%c1_138, %c0_139, %c0_140] : memref<2x128x32xf32, #tpu.memory_space<vmem>>, vector<1x128x32xf32>
    %298 = vector.shape_cast %297 : vector<1x128x32xf32> to vector<128x32xf32>
    %cst_141 = arith.constant dense<0.000000e+00> : vector<10x32xf32>
    %299 = tpu.matmul %296, %298, %cst_141 {dimension_numbers = #tpu.dot_dimension_numbers<[1], [0], [0], [1], [0, 0, 1, 1], [], []>} : vector<10x128xf32>, vector<128x32xf32>, vector<10x32xf32> -> vector<10x32xf32>
    %300 = vector.extract_strided_slice %161 {offsets = [5, 0], sizes = [1, 32], strides = [1, 1]} : vector<6x32xf32> to vector<1x32xf32>
    %301 = vector.broadcast %300 : vector<1x32xf32> to vector<10x32xf32>
    %302 = arith.addf %299, %301 : vector<10x32xf32>
    %303 = arith.addf %257, %302 : vector<10x32xf32>
    %c0_142 = arith.constant 0 : index
    %c0_143 = arith.constant 0 : index
    %304 = vector.load %arg12[%c0_142, %c0_143] : memref<10x32xf32, #tpu.memory_space<vmem>>, vector<10x32xf32>
    tpu.vector_store %arg12[%c0_142, %c0_143], %303 {strides = array<i32>} : memref<10x32xf32, #tpu.memory_space<vmem>>, vector<10x32xf32>,
    %c0_144 = arith.constant 0 : index
    %c0_145 = arith.constant 0 : index
    %305 = vector.load %arg12[%c0_144, %c0_145] : memref<10x32xf32, #tpu.memory_space<vmem>>, vector<10x32xf32>
    %c2 = arith.constant 2 : index
    %c0_146 = arith.constant 0 : index
    %306 = vector.load %arg3[%c2, %c0_146] : memref<4x32xf32, #tpu.memory_space<vmem>>, vector<1x32xf32>
    %c3 = arith.constant 3 : index
    %c0_147 = arith.constant 0 : index
    %307 = vector.load %arg3[%c3, %c0_147] : memref<4x32xf32, #tpu.memory_space<vmem>>, vector<1x32xf32>
    %cst_148 = arith.constant dense<0.000000e+00> : vector<10xf32>
    %308 = vector.multi_reduction <add>, %305, %cst_148 [1] : vector<10x32xf32> to vector<10xf32>
    %309 = vector.shape_cast %308 : vector<10xf32> to vector<10x1xf32>
    %cst_149 = arith.constant 3.200000e+01 : f32
    %310 = vector.broadcast %cst_149 : f32 to vector<10x1xf32>
    %311 = arith.divf %309, %310 : vector<10x1xf32>
    %312 = vector.broadcast %311 : vector<10x1xf32> to vector<10x32xf32>
    %313 = arith.subf %305, %312 : vector<10x32xf32>
    %314 = arith.mulf %313, %313 : vector<10x32xf32>
    %cst_150 = arith.constant dense<0.000000e+00> : vector<10xf32>
    %315 = vector.multi_reduction <add>, %314, %cst_150 [1] : vector<10x32xf32> to vector<10xf32>
    %316 = vector.shape_cast %315 : vector<10xf32> to vector<10x1xf32>
    %cst_151 = arith.constant 3.200000e+01 : f32
    %317 = vector.broadcast %cst_151 : f32 to vector<10x1xf32>
    %318 = arith.divf %316, %317 : vector<10x1xf32>
    %319 = vector.broadcast %311 : vector<10x1xf32> to vector<10x32xf32>
    %320 = arith.subf %305, %319 : vector<10x32xf32>
    %cst_152 = arith.constant 9.99999996E-13 : f32
    %321 = vector.broadcast %cst_152 : f32 to vector<10x1xf32>
    %322 = arith.addf %318, %321 : vector<10x1xf32>
    %323 = math.rsqrt %322 : vector<10x1xf32>
    %324 = vector.broadcast %323 : vector<10x1xf32> to vector<10x32xf32>
    %325 = arith.mulf %320, %324 : vector<10x32xf32>
    %326 = vector.broadcast %306 : vector<1x32xf32> to vector<10x32xf32>
    %327 = arith.mulf %325, %326 : vector<10x32xf32>
    %328 = vector.broadcast %307 : vector<1x32xf32> to vector<10x32xf32>
    %329 = arith.addf %327, %328 : vector<10x32xf32>
    %330 = vector.extract_strided_slice %329 {offsets = [0, 0], sizes = [5, 32], strides = [1, 1]} : vector<10x32xf32> to vector<5x32xf32>
    %cst_153 = arith.constant dense<0.000000e+00> : vector<32xf32>
    %331 = vector.multi_reduction <add>, %330, %cst_153 [0] : vector<5x32xf32> to vector<32xf32>
    %332 = vector.shape_cast %331 : vector<32xf32> to vector<1x32xf32>
    %cst_154 = arith.constant 5.000000e+00 : f32
    %333 = vector.broadcast %cst_154 : f32 to vector<1x32xf32>
    %334 = arith.divf %332, %333 : vector<1x32xf32>
    %c0_155 = arith.constant 0 : index
    %c0_156 = arith.constant 0 : index
    %335 = vector.load %arg11[%c0_155, %c0_156] : memref<2x32xf32, #tpu.memory_space<vmem>>, vector<1x32xf32>
    tpu.vector_store %arg11[%c0_155, %c0_156], %334 {strides = array<i32>} : memref<2x32xf32, #tpu.memory_space<vmem>>, vector<1x32xf32>,
    %336 = vector.extract_strided_slice %329 {offsets = [5, 0], sizes = [5, 32], strides = [1, 1]} : vector<10x32xf32> to vector<5x32xf32>
    %cst_157 = arith.constant dense<0.000000e+00> : vector<32xf32>
    %337 = vector.multi_reduction <add>, %336, %cst_157 [0] : vector<5x32xf32> to vector<32xf32>
    %338 = vector.shape_cast %337 : vector<32xf32> to vector<1x32xf32>
    %cst_158 = arith.constant 5.000000e+00 : f32
    %339 = vector.broadcast %cst_158 : f32 to vector<1x32xf32>
    %340 = arith.divf %338, %339 : vector<1x32xf32>
    %c1_159 = arith.constant 1 : index
    %c0_160 = arith.constant 0 : index
    %341 = vector.load %arg11[%c1_159, %c0_160] : memref<2x32xf32, #tpu.memory_space<vmem>>, vector<1x32xf32>
    tpu.vector_store %arg11[%c1_159, %c0_160], %340 {strides = array<i32>} : memref<2x32xf32, #tpu.memory_space<vmem>>, vector<1x32xf32>,
    return
  }
}

</mosaic_0001>

<bundles_post_ra>
// kernel: tpu_custom_call.1
= control target key start
LH: loop header
LB: loop body
LE: loop exit
PB: predicated region body
PF: predicated region fallthrough
CT: control target
= control target key end

     0   :  { %v6948_v1 = vmov 0.0   ;;  %vm6949_vm0 = vmmov 0   ;;  %s8159_s0 = inlined_call_operand.vmem [shape: f32[8,48], index: 0, kind: input, shape index: {}]   ;;  %s8160_s1 = inlined_call_operand.vmem [shape: f32[8,32], index: 1, kind: input, shape index: {}]   ;;  %s8161_s2 = inlined_call_operand.vmem [shape: f32[48,32], index: 2, kind: input, shape index: {}]   ;;  %s8162_s3 = inlined_call_operand.vmem [shape: f32[4,32], index: 3, kind: input, shape index: {}]   ;;  %s8163_s4 = inlined_call_operand.vmem [shape: f32[2,4,32,24], index: 4, kind: input, shape index: {}]   ;;  %s8164_s5 = inlined_call_operand.vmem [shape: f32[2,4,1,24], index: 5, kind: input, shape index: {}]   ;;  %s8165_s6 = inlined_call_operand.vmem [shape: f32[2,4,8,32], index: 6, kind: input, shape index: {}]   ;;  %s8166_s7 = inlined_call_operand.vmem [shape: f32[2,32,128], index: 7, kind: input, shape index: {}]   ;;  %s8167_s8 = inlined_call_operand.vmem [shape: f32[2,1,128], index: 8, kind: input, shape index: {}]   ;;  %s8168_s9 = inlined_call_operand.vmem [shape: f32[2,128,32], index: 9, kind: input, shape index: {}]   ;;  %s8169_s10 = inlined_call_operand.vmem [shape: f32[2,6,32], index: 10, kind: input, shape index: {}]   ;;  %s8170_s11 = inlined_call_operand.hbm [shape: f32[2,32], index: 11, kind: output, shape index: {}]  }
   0x1   :  { %v45_v0 = vld [vmem:[%s8161_s2 + $0x28] sm:$0xff]  ;;  %6304 = vmatprep.subr.mxu1 %v6948_v1  ;;  %v44_v2 = vld [vmem:[%s8161_s2 + $0x20] sm:$0xff]  ;;  %6316 = vmatprep.mubr.msk.f32.mxu1 %vm6949_vm0, %v6948_v1 }
   0x2   :  { %6305 = vmatpush3.msra.mxu1 %v45_v0  ;;  %6341 = vmatprep.subr.mxu0 %v6948_v1 }
   0x3   :  { %16 = vsyncpa [#allocation4], 0  ;;  %6306 = vmatprep.subr.mxu1 %v6948_v1  ;;  %v43_v3 = vld [vmem:[%s8161_s2 + $0x18] sm:$0xff]  ;;  %6349 = vmatprep.mubr.msk.f32.mxu0 %vm6949_vm0, %v6948_v1  ;;  %v42_v4 = vld [vmem:[%s8161_s2 + $0x10] sm:$0xff]  ;;  %vm51_vm1 = vcmask 392192   ;;  %vm128_vm2 = vcmask 253952   ;;  %v167_v33 = vlaneseq }
   0x4   :  { %6307 = vmatpush3.msra.mxu1 %v44_v2  ;;  %v41_v5 = vld [vmem:[%s8161_s2 + $0x8] sm:$0xff]  ;;  %v40_v6 = vld [vmem:[%s8161_s2] sm:$0xff]  ;;  %vm130_vm3 = vcmask 257024   ;;  %vm133_vm4 = vcmask 261124   ;;  %vm138_vm5 = vcmask 261120   ;;  %v7068_v22 = vld [vmem:[%s8163_s4 + $0x18] sm:$0xff] }
   0x5   :  { %6308 = vmatprep.subr.mxu1 %v6948_v1  ;;  %v39_v7 = vld [vmem:[%s8159_s0] sm:$0xff]  ;;  %v7074_v23 = vld [vmem:[%s8163_s4 + $0x58] sm:$0xff]  ;;  %v7081_v24 = vld [vmem:[%s8163_s4 + $0x10] sm:$0xff]  ;;  %v7121_v34 = vshrl.u32 %v167_v33, 7  ;;  %s6950_s12 = smov 120   ;;  %vm513_vm6 = vcmask 64512  }
   0x6   :  { %6309 = vmatpush3.msra.mxu1 %v43_v3  ;;  %v127_v8 = vld [vmem:[%s8162_s3 + $0x1] sm:$0x1]  ;;  %v5913_v9 = vld [vmem:[%s8162_s3] ss:$0 sm:$0xff]  ;;  %6342 = vmatpush3.msra.mxu0 %v7074_v23  ;;  %v7088_v25 = vld [vmem:[%s8163_s4 + $0x50] sm:$0xff]  ;;  %vm823_vm7 = vcmask 36864  }
   0x7   :  { %6310 = vmatprep.subr.mxu1 %v6948_v1  ;;  %129 = vst.msk [vmem:[#allocation2] sm:$0x1] %vm128_vm2, %v127_v8  ;;  %132 = vst.msk [vmem:[#allocation2 + $0x5] sm:$0x1] %vm128_vm2, %v127_v8  ;;  %v125_v11 = vld [vmem:[%s8160_s1] sm:$0xff]  ;;  %6343 = vmatprep.subr.mxu0 %v6948_v1  ;;  %v7093_v26 = vld [vmem:[%s8163_s4 + $0x8] sm:$0xff] }
   0x8   :  { %6311 = vmatpush3.msra.mxu1 %v42_v4  ;;  %v7098_v27 = vld [vmem:[%s8163_s4 + $0x48] sm:$0xff]  ;;  %6344 = vmatpush3.msra.mxu0 %v7088_v25  ;;  %v7105_v28 = vld [vmem:[%s8163_s4] sm:$0xff]  ;;  %v169_v35 = vsub.s32 0, %v7121_v34  ;;  %v175_v37 = vsub.s32 1, %v7121_v34  ;;  %v7147_v44 = vld [vmem:[%s8163_s4 + $0x38] sm:$0xff]  ;;  %s6951_s15 = smov 112  }
   0x9   :  { %6312 = vmatprep.subr.mxu1 %v6948_v1  ;;  %6345 = vmatprep.subr.mxu0 %v6948_v1  ;;  %v7112_v29 = vld [vmem:[%s8163_s4 + $0x40] sm:$0xff]  ;;  %v7156_v45 = vld [vmem:[%s8163_s4 + $0x30] sm:$0xff]  ;;  %v7165_v46 = vld [vmem:[%s8163_s4 + $0x28] sm:$0xff]  ;;  %vm874_vm8 = vcmask 1044480   ;;  %vm142_vm9 = vcmask 254976   ;;  %vm870_vm10 = vcmask 39936  }
   0xa   :  { %6313 = vmatpush3.msra.mxu1 %v41_v5  ;;  %6346 = vmatpush3.msra.mxu0 %v7098_v27  ;;  %v7127_v36 = vld [vmem:[%s8169_s10] sm:$0x3f]  ;;  %v7181_v48 = vld [vmem:[%s8163_s4 + $0x78] sm:$0xff]  ;;  %v7190_v49 = vld [vmem:[%s8163_s4 + $0x70] sm:$0xff]  ;;  %vm1486_vm11 = vcmask 1042432   ;;  %vm1470_vm12 = vcmask 258048  }
   0xb   :  { %6314 = vmatprep.subr.mxu1 %v6948_v1  ;;  %6347 = vmatprep.subr.mxu0 %v6948_v1  ;;  %v7133_v38 = vrot.slane %v7127_v36, %v169_v35  ;;  %v7138_v41 = vrot.slane %v7127_v36, %v175_v37  ;;  %v7174_v47 = vld [vmem:[%s8163_s4 + $0x20] sm:$0xff]  ;;  %v7199_v50 = vld [vmem:[%s8163_s4 + $0x68] sm:$0xff]  ;;  %vm2741_vm13 = vcmask 261125  }
   0xc   :  { %6315 = vmatpush3.msra.mxu1 %v40_v6  ;;  %6348 = vmatpush3.msra.mxu0 %v7112_v29  ;;  %v7206_v51 = vld [vmem:[%s8163_s4 + $0x60] sm:$0xff] }
   0xd   :  { %6317 = vmatmul.mubr.msk.f32.vlgmr.msra.gmra.mxu1 %vm51_vm1, %v39_v7  ;;  %6319 = vmatprep.subr.mxu1 %v6948_v1  ;;  %v7219_v52 = vld [vmem:[%s8164_s5] ss:$0 sm:$0xff]  ;;  %v7224_v53 = vld [vmem:[%s8164_s5 + $0x2] ss:$0 sm:$0xff]  ;;  %v7236_v60 = vld [vmem:[%s8164_s5 + $0x1] ss:$0 sm:$0xff] }
   0xe   :  { %6327 = vmatprep.mubr.msk.f32.mxu1 %vm6949_vm0, %v6948_v1  ;;  %6320 = vmatpush3.msra.mxu1 %v7068_v22  ;;  %v7243_v0 = vld [vmem:[%s8164_s5 + $0x3] ss:$0 sm:$0xff] }
   0xf   :  { %6321 = vmatprep.subr.mxu1 %v6948_v1  ;;  %6363 = vmatprep.subr.mxu0 %v6948_v1 }
  0x10   :  { %6322 = vmatpush3.msra.mxu1 %v7081_v24 }
  0x11   :  { %6323 = vmatprep.subr.mxu1 %v6948_v1 }
  0x12   :  { %6324 = vmatpush3.msra.mxu1 %v7093_v26 }
  0x13   :  { %6325 = vmatprep.subr.mxu1 %v6948_v1 }
  0x14   :  { %6326 = vmatpush3.msra.mxu1 %v7105_v28 }
  0x15   :  { %6330 = vmatprep.subr.mxu1 %v6948_v1 }
  0xcd   :  { %v121_v10 = vpop.f32.mrf.mxu1 }
  0xce   :  { %v122_v12 = vadd.f32 %v5913_v9, %v121_v10 }
  0xcf   :  { %v6318_v13 = vpop.f32.mrf.mxu1 }
  0xd0   :  { %v126_v14 = vadd.f32 %v125_v11, %v122_v12 }
  0xd2   :  { %131 = vst.msk [vmem:[#allocation2 + $0x1] sm:$0xf] %vm130_vm3, %v126_v14 }
  0xd3   :  { %134 = vst.msk [vmem:[#allocation2 + $0x2] sm:$0xf0] %vm133_vm4, %v126_v14 }
  0xda   :  { %v7059_v15 = vld [vmem:[#allocation2] sm:$0xff] }
  0xdb   :  { %v139_v16 = vsel %vm138_vm5, %v7059_v15, 0.0 }
  0xdc   :  { %140 = vadd.xlane.f32.xlu0 %v139_v16 }
 0x165   :  { %v141_v17 = vpop.xlane.xlu0 %140 }
 0x166   :  { %v147_v18 = vmul.f32 0.03125, %v141_v17 }
 0x168   :  { %v149_v19 = vsub.f32 %v7059_v15, %v147_v18 }
 0x16a   :  { %v151_v20 = vmul.f32 %v149_v19, %v149_v19 }
 0x16c   :  { %v153_v21 = vsel %vm138_vm5, %v151_v20, 0.0 }
 0x16d   :  { %154 = vadd.xlane.f32.xlu0 %v153_v21 }
 0x1f6   :  { %v155_v30 = vpop.xlane.xlu0 %154 }
 0x1f7   :  { %v159_v31 = vmul.f32 0.03125, %v155_v30 }
 0x1f9   :  { %v161_v32 = vadd.f32 1e-12, %v159_v31 }
 0x1fb   :  { %6832 = vrsqrt.f32 %v161_v32 }
 0x208   :  { %v6833_v39 = vpop.eup %6832 }
 0x209   :  { %v165_v40 = vmul.f32 %v6833_v39, %v149_v19 }
 0x20b   :  { %v171_v42 = vmul.f32 %v7133_v38, %v165_v40 }
 0x20d   :  { %v7142_v43 = vadd.f32 %v7138_v41, %v171_v42 }
 0x20f   :  { %6328 = vmatmul.mubr.msk.f32.vlgmr.msra.gmra.mxu1 %vm138_vm5, %v7142_v43  ;;  %6350 = vmatmul.mubr.msk.f32.vlgmr.msra.gmra.mxu0 %vm138_vm5, %v7142_v43 }
 0x210   :  { %6331 = vmatpush3.msra.mxu1 %v7147_v44  ;;  %6338 = vmatprep.mubr.msk.f32.mxu1 %vm6949_vm0, %v6948_v1 }
 0x211   :  { %6332 = vmatprep.subr.mxu1 %v6948_v1  ;;  %6365 = vmatprep.mubr.msk.f32.mxu0 %vm6949_vm0, %v6948_v1 }
 0x212   :  { %6333 = vmatpush3.msra.mxu1 %v7156_v45 }
 0x213   :  { %6334 = vmatprep.subr.mxu1 %v6948_v1 }
 0x214   :  { %6335 = vmatpush3.msra.mxu1 %v7165_v46 }
 0x215   :  { %6336 = vmatprep.subr.mxu1 %v6948_v1 }
 0x216   :  { %6337 = vmatpush3.msra.mxu1 %v7174_v47 }
 0x217   :  { %6339 = vmatmul.mubr.msk.f32.vlgmr.msra.gmra.mxu1 %vm138_vm5, %v7142_v43  ;;  %6352 = vmatprep.subr.mxu1 %v6948_v1 }
 0x218   :  { %6353 = vmatpush3.msra.mxu1 %v7181_v48  ;;  %6360 = vmatprep.mubr.msk.f32.mxu1 %vm6949_vm0, %v6948_v1 }
 0x219   :  { %6354 = vmatprep.subr.mxu1 %v6948_v1 }
 0x21a   :  { %6355 = vmatpush3.msra.mxu1 %v7190_v49 }
 0x21b   :  { %6356 = vmatprep.subr.mxu1 %v6948_v1 }
 0x21c   :  { %6357 = vmatpush3.msra.mxu1 %v7199_v50 }
 0x21d   :  { %6358 = vmatprep.subr.mxu1 %v6948_v1 }
 0x21e   :  { %6359 = vmatpush3.msra.mxu1 %v7206_v51 }
 0x21f   :  { %6361 = vmatmul.mubr.msk.f32.vlgmr.msra.gmra.mxu1 %vm138_vm5, %v7142_v43  ;;  %6373 = vmatprep.subr.mxu1 %v6948_v1 }
 0x220   :  { %6375 = vmatprep.mubr.msk.f32.mxu1 %vm6949_vm0, %v6948_v1 }
 0x2cf   :  { %v296_v54 = vpop.f32.mrf.mxu1  ;;  %v436_v55 = vpop.f32.mrf.mxu0 }
 0x2d0   :  { %v297_v56 = vadd.f32 %v7219_v52, %v296_v54  ;;  %v7228_v57 = vadd.f32 %v7224_v53, %v436_v55 }
 0x2d1   :  { %v6329_v58 = vpop.f32.mrf.mxu1  ;;  %v6351_v59 = vpop.f32.mrf.mxu0 }
 0x2d2   :  { %666 = vrot.lane.b32.xlu0 %v7228_v57, %s6950_s12  ;;  %511 = vrot.lane.b32.xlu1 %v297_v56, %s6950_s12 }
 0x2d7   :  { %v366_v61 = vpop.f32.mrf.mxu1 }
 0x2d8   :  { %v367_v62 = vadd.f32 %v7236_v60, %v366_v61 }
 0x2d9   :  { %v6340_v63 = vpop.f32.mrf.mxu1 }
 0x2da   :  { %589 = vrot.lane.b32.xlu1 %v367_v62, %s6950_s12 }
 0x2df   :  { %v506_v2 = vpop.f32.mrf.mxu1 }
 0x2e0   :  { %v7246_v3 = vadd.f32 %v7243_v0, %v506_v2 }
 0x2e1   :  { %v6362_v4 = vpop.f32.mrf.mxu1 }
 0x2e2   :  { %743 = vrot.lane.b32.xlu1 %v7246_v3, %s6950_s12 }
 0x344   :  { %v667_v5 = vpop.permute.xlu0 %666  ;;  %v512_v6 = vpop.permute.xlu1 %511 }
 0x345   :  { %6364 = vmatpush3.xpose.msk.msra.mxu0 %vm513_vm6, %v512_v6  ;;  %6374 = vmatpush3.xpose.msk.msra.mxu1 %vm513_vm6, %v667_v5 }
 0x346   :  { %6368 = vmatprep.subr.mxu0 %v6948_v1  ;;  %6383 = vmatprep.subr.mxu1 %v6948_v1 }
 0x348   :  { %6366 = vmatmul.mubr.msk.f32.vlgmr.msra.gmra.mxu0 %vm513_vm6, %v297_v56  ;;  %6376 = vmatmul.mubr.msk.f32.vlgmr.msra.gmra.mxu1 %vm513_vm6, %v7228_v57 }
 0x349   :  { %6370 = vmatprep.mubr.msk.f32.mxu0 %vm6949_vm0, %v6948_v1  ;;  %6385 = vmatprep.mubr.msk.f32.mxu1 %vm6949_vm0, %v6948_v1 }
 0x34c   :  { %v590_v7 = vpop.permute.xlu1 %589 }
 0x34d   :  { %6369 = vmatpush3.xpose.msk.msra.mxu0 %vm513_vm6, %v590_v7 }
 0x34e   :  { %6378 = vmatprep.subr.mxu0 %v6948_v1 }
 0x350   :  { %6371 = vmatmul.mubr.msk.f32.vlgmr.msra.gmra.mxu0 %vm513_vm6, %v367_v62 }
 0x351   :  { %6380 = vmatprep.mubr.msk.f32.mxu0 %vm6949_vm0, %v6948_v1 }
 0x354   :  { %v744_v8 = vpop.permute.xlu1 %743 }
 0x355   :  { %6379 = vmatpush3.xpose.msk.msra.mxu0 %vm513_vm6, %v744_v8 }
 0x356   :  { %6388 = vmatprep.subr.mxu0 %v6948_v1 }
 0x358   :  { %6381 = vmatmul.mubr.msk.f32.vlgmr.msra.gmra.mxu0 %vm513_vm6, %v7246_v3 }
 0x359   :  { %6390 = vmatprep.mubr.msk.f32.mxu0 %vm6949_vm0, %v6948_v1 }
 0x408   :  { %v584_v9 = vpop.f32.mrf.mxu0  ;;  %v738_v10 = vpop.f32.mrf.mxu1 }
 0x409   :  { %v819_v11 = vmul.f32 0.35355338, %v584_v9  ;;  %v821_v14 = vmul.f32 0.35355338, %v738_v10 }
 0x40a   :  { %v6367_v12 = vpop.f32.mrf.mxu0  ;;  %v6377_v13 = vpop.f32.mrf.mxu1 }
 0x40b   :  { %v824_v16 = vsel %vm823_vm7, %v819_v11, -inf  ;;  %v830_v17 = vsel %vm823_vm7, %v821_v14, -inf }
 0x40c   :  { %825 = vmax.xlane.f32.xlu1 %v824_v16 }
 0x410   :  { %v661_v18 = vpop.f32.mrf.mxu0  ;;  %831 = vmax.xlane.f32.xlu1 %v830_v17 }
 0x411   :  { %v820_v19 = vmul.f32 0.35355338, %v661_v18 }
 0x412   :  { %v6372_v20 = vpop.f32.mrf.mxu0 }
 0x413   :  { %v827_v21 = vsel %vm823_vm7, %v820_v19, -inf }
 0x414   :  { %828 = vmax.xlane.f32.xlu0 %v827_v21 }
 0x418   :  { %v815_v30 = vpop.f32.mrf.mxu0 }
 0x419   :  { %v822_v31 = vmul.f32 0.35355338, %v815_v30 }
 0x41a   :  { %v6382_v32 = vpop.f32.mrf.mxu0 }
 0x41b   :  { %v833_v33 = vsel %vm823_vm7, %v822_v31, -inf }
 0x41c   :  { %834 = vmax.xlane.f32.xlu1 %v833_v33 }
 0x42a   :  { %868 = vrot.lane.b32.xlu0 %v297_v56, %s6951_s15 }
 0x42d   :  { %947 = vrot.lane.b32.xlu1 %v367_v62, %s6951_s15 }
 0x495   :  { %v826_v39 = vpop.xlane.xlu1 %825 }
 0x496   :  { %v836_v40 = vsub.f32 %v819_v11, %v826_v39 }
 0x498   :  { %v840_v42 = vmul.f32 1.442695, %v836_v40 }
 0x499   :  { %v832_v54 = vpop.xlane.xlu1 %831 }
 0x49a   :  { %6834 = vpow2.f32 %v840_v42  ;;  %v838_v55 = vsub.f32 %v821_v14, %v832_v54  ;;  %v7290_v14 = vld [vmem:[#allocation2 + $0x8] sm:$0x3] }
 0x49b   :  { %v143_v16 = vsel %vm142_vm9, %v7290_v14, 0.0 }
 0x49c   :  { %v844_v58 = vmul.f32 1.442695, %v838_v55 }
 0x49d   :  { %v829_v59 = vpop.xlane.xlu0 %828 }
 0x49e   :  { %6836 = vpow2.f32 %v844_v58  ;;  %v837_v61 = vsub.f32 %v820_v19, %v829_v59 }
 0x4a0   :  { %v842_v63 = vmul.f32 1.442695, %v837_v61 }
 0x4a1   :  { %v869_v2 = vpop.permute.xlu0 %868 }
 0x4a2   :  { %6838 = vpow2.f32 %v842_v63  ;;  %6384 = vmatpush3.msk.msra.mxu1 %vm874_vm8, %v869_v2  ;;  %v7315_v63 = vld [vmem:[%s8165_s6] sm:$0xff]  ;;  %v7322_v2 = vld [vmem:[%s8165_s6 + $0x8] sm:$0xff] }
 0x4a3   :  { %6393 = vmatprep.subr.mxu1 %v6948_v1 }
 0x4a5   :  { %v835_v56 = vpop.xlane.xlu1 %834 }
 0x4a6   :  { %v839_v62 = vsub.f32 %v822_v31, %v835_v56  ;;  %v7329_v56 = vld [vmem:[%s8165_s6 + $0x10] sm:$0xff] }
 0x4a7   :  { %v6835_v4 = vpop.eup %6834 }
 0x4a8   :  { %v846_v5 = vmul.f32 1.442695, %v839_v62  ;;  %v848_v6 = vsel %vm823_vm7, %v6835_v4, 0.0 }
 0x4a9   :  { %v948_v7 = vpop.permute.xlu1 %947  ;;  %849 = vadd.xlane.f32.xlu1 %v848_v6 }
 0x4aa   :  { %6840 = vpow2.f32 %v846_v5  ;;  %6389 = vmatpush3.msk.msra.mxu0 %vm874_vm8, %v948_v7 }
 0x4ab   :  { %v6837_v8 = vpop.eup %6836  ;;  %6398 = vmatprep.subr.mxu0 %v6948_v1 }
 0x4ac   :  { %v854_v9 = vsel %vm823_vm7, %v6837_v8, 0.0 }
 0x4ad   :  { %855 = vadd.xlane.f32.xlu0 %v854_v9  ;;  %v7340_v9 = vld [vmem:[%s8165_s6 + $0x18] sm:$0xff] }
 0x4af   :  { %v6839_v10 = vpop.eup %6838 }
 0x4b0   :  { %v851_v11 = vsel %vm823_vm7, %v6839_v10, 0.0 }
 0x4b1   :  { %852 = vadd.xlane.f32.xlu1 %v851_v11 }
 0x4b7   :  { %v6841_v12 = vpop.eup %6840 }
 0x4b8   :  { %v857_v13 = vsel %vm823_vm7, %v6841_v12, 0.0 }
 0x4b9   :  { %858 = vadd.xlane.f32.xlu1 %v857_v13 }
 0x4c3   :  { %1101 = vrot.lane.b32.xlu0 %v7246_v3, %s6951_s15 }
 0x4ca   :  { %1024 = vrot.lane.b32.xlu1 %v7228_v57, %s6951_s15 }
 0x4ee   :  { %144 = vadd.xlane.f32.xlu1 %v143_v16  ;;  %v1487_v16 = vrot.slane %v7142_v43, 5 }
 0x532   :  { %v850_v17 = vpop.xlane.xlu1 %849 }
 0x533   :  { %6842 = vrcp.f32 %v850_v17 }
 0x536   :  { %v856_v18 = vpop.xlane.xlu0 %855 }
 0x537   :  { %6844 = vrcp.f32 %v856_v18 }
 0x53a   :  { %v853_v19 = vpop.xlane.xlu1 %852  ;;  %v1102_v39 = vpop.permute.xlu0 %1101 }
 0x53b   :  { %6846 = vrcp.f32 %v853_v19 }
 0x540   :  { %v6843_v20 = vpop.eup %6842 }
 0x541   :  { %v864_v21 = vmul.f32 %v6843_v20, %v6835_v4 }
 0x542   :  { %v859_v3 = vpop.xlane.xlu1 %858 }
 0x543   :  { %6848 = vrcp.f32 %v859_v3  ;;  %6386 = vmatmul.mubr.msk.f32.vlgmr.msra.gmra.mxu1 %vm870_vm10, %v864_v21 }
 0x544   :  { %v6845_v57 = vpop.eup %6844  ;;  %6395 = vmatprep.mubr.msk.f32.mxu1 %vm6949_vm0, %v6948_v1 }
 0x545   :  { %v866_v30 = vmul.f32 %v6845_v57, %v6837_v8 }
 0x546   :  { %v1025_v31 = vpop.permute.xlu1 %1024 }
 0x547   :  { %6394 = vmatpush3.msk.msra.mxu1 %vm874_vm8, %v1025_v31 }
 0x548   :  { %v6847_v32 = vpop.eup %6846  ;;  %6396 = vmatmul.mubr.msk.f32.vlgmr.msra.gmra.mxu1 %vm870_vm10, %v866_v30  ;;  %6403 = vmatprep.subr.mxu1 %v6948_v1 }
 0x549   :  { %v865_v33 = vmul.f32 %v6847_v32, %v6839_v10  ;;  %6405 = vmatprep.mubr.msk.f32.mxu1 %vm6949_vm0, %v6948_v1  ;;  %6404 = vmatpush3.msra.mxu1 %v7315_v63 }
 0x54a   :  { %6413 = vmatprep.subr.mxu1 %v6948_v1 }
 0x54b   :  { %6391 = vmatmul.mubr.msk.f32.vlgmr.msra.gmra.mxu0 %vm870_vm10, %v865_v33 }
 0x54c   :  { %6399 = vmatpush3.msk.msra.mxu0 %vm874_vm8, %v1102_v39  ;;  %6400 = vmatprep.mubr.msk.f32.mxu0 %vm6949_vm0, %v6948_v1 }
 0x54d   :  { %6408 = vmatprep.subr.mxu0 %v6948_v1 }
 0x550   :  { %v6849_v40 = vpop.eup %6848 }
 0x551   :  { %v867_v42 = vmul.f32 %v6849_v40, %v6841_v12 }
 0x553   :  { %6401 = vmatmul.mubr.msk.f32.vlgmr.msra.gmra.mxu0 %vm870_vm10, %v867_v42 }
 0x554   :  { %6410 = vmatprep.mubr.msk.f32.mxu0 %vm6949_vm0, %v6948_v1  ;;  %6409 = vmatpush3.msra.mxu0 %v7322_v2 }
 0x555   :  { %6418 = vmatprep.subr.mxu0 %v6948_v1 }
 0x577   :  { %v145_v54 = vpop.xlane.xlu1 %144 }
 0x578   :  { %v148_v55 = vmul.f32 0.03125, %v145_v54 }
 0x57a   :  { %v150_v58 = vsub.f32 %v7290_v14, %v148_v55 }
 0x57c   :  { %v152_v59 = vmul.f32 %v150_v58, %v150_v58 }
 0x57e   :  { %v156_v61 = vsel %vm142_vm9, %v152_v59, 0.0 }
 0x57f   :  { %157 = vadd.xlane.f32.xlu0 %v156_v61 }
 0x603   :  { %v943_v62 = vpop.f32.mrf.mxu1 }
 0x604   :  { %6406 = vmatmul.mubr.msk.f32.vlgmr.msra.gmra.mxu1 %vm513_vm6, %v943_v62 }
 0x605   :  { %v6387_v4 = vpop.f32.mrf.mxu1  ;;  %6414 = vmatpush3.msra.mxu1 %v7329_v56  ;;  %6415 = vmatprep.mubr.msk.f32.mxu1 %vm6949_vm0, %v6948_v1 }
 0x606   :  { %6423 = vmatprep.subr.mxu1 %v6948_v1 }
 0x608   :  { %v158_v5 = vpop.xlane.xlu0 %157  ;;  %v1097_v6 = vpop.f32.mrf.mxu1 }
 0x609   :  { %v160_v7 = vmul.f32 0.03125, %v158_v5  ;;  %6416 = vmatmul.mubr.msk.f32.vlgmr.msra.gmra.mxu1 %vm513_vm6, %v1097_v6 }
 0x60a   :  { %v6397_v8 = vpop.f32.mrf.mxu1  ;;  %6424 = vmatpush3.msra.mxu1 %v7068_v22  ;;  %6431 = vmatprep.mubr.msk.f32.mxu1 %vm6949_vm0, %v6948_v1 }
 0x60b   :  { %v162_v10 = vadd.f32 1e-12, %v160_v7  ;;  %v1020_v11 = vpop.f32.mrf.mxu0  ;;  %6425 = vmatprep.subr.mxu1 %v6948_v1 }
 0x60c   :  { %6411 = vmatmul.mubr.msk.f32.vlgmr.msra.gmra.mxu0 %vm513_vm6, %v1020_v11  ;;  %6426 = vmatpush3.msra.mxu1 %v7081_v24 }
 0x60d   :  { %6850 = vrsqrt.f32 %v162_v10  ;;  %v6392_v12 = vpop.f32.mrf.mxu0  ;;  %6419 = vmatpush3.msra.mxu0 %v7340_v9  ;;  %6420 = vmatprep.mubr.msk.f32.mxu0 %vm6949_vm0, %v6948_v1 }
 0x60e   :  { %6434 = vmatprep.subr.mxu0 %v6948_v1  ;;  %6427 = vmatprep.subr.mxu1 %v6948_v1 }
 0x60f   :  { %6428 = vmatpush3.msra.mxu1 %v7093_v26 }
 0x610   :  { %6429 = vmatprep.subr.mxu1 %v6948_v1 }
 0x611   :  { %6430 = vmatpush3.msra.mxu1 %v7105_v28 }
 0x612   :  { %6445 = vmatprep.subr.mxu1 %v6948_v1 }
 0x613   :  { %v1174_v22 = vpop.f32.mrf.mxu0 }
 0x614   :  { %6421 = vmatmul.mubr.msk.f32.vlgmr.msra.gmra.mxu0 %vm513_vm6, %v1174_v22 }
 0x615   :  { %v6402_v24 = vpop.f32.mrf.mxu0  ;;  %6435 = vmatpush3.msra.mxu0 %v7147_v44  ;;  %6442 = vmatprep.mubr.msk.f32.mxu0 %vm6949_vm0, %v6948_v1 }
 0x616   :  { %6436 = vmatprep.subr.mxu0 %v6948_v1 }
 0x617   :  { %6437 = vmatpush3.msra.mxu0 %v7156_v45 }
 0x618   :  { %6438 = vmatprep.subr.mxu0 %v6948_v1 }
 0x619   :  { %6439 = vmatpush3.msra.mxu0 %v7165_v46 }
 0x61a   :  { %v6851_v26 = vpop.eup %6850  ;;  %6440 = vmatprep.subr.mxu0 %v6948_v1 }
 0x61b   :  { %6441 = vmatpush3.msra.mxu0 %v7174_v47  ;;  %v166_v28 = vmul.f32 %v6851_v26, %v150_v58 }
 0x61c   :  { %6456 = vmatprep.subr.mxu0 %v6948_v1 }
 0x61d   :  { %v172_v44 = vmul.f32 %v7133_v38, %v166_v28 }
 0x61f   :  { %v178_v13 = vadd.f32 %v7138_v41, %v172_v44 }
 0x621   :  { %v1488_v45 = vrot.slane %v178_v13, 5 }
 0x623   :  { %v1489_v17 = vsel %vm1486_vm11, %v1487_v16, %v1488_v45 }
 0x624   :  { %6432 = vmatmul.mubr.msk.f32.vlgmr.msra.gmra.mxu1 %vm138_vm5, %v1489_v17  ;;  %6443 = vmatmul.mubr.msk.f32.vlgmr.msra.gmra.mxu0 %vm138_vm5, %v1489_v17 }
 0x625   :  { %6446 = vmatpush3.msra.mxu1 %v7074_v23  ;;  %6457 = vmatpush3.msra.mxu0 %v7181_v48  ;;  %v1480_v48 = vsub.s32 2, %v7121_v34 }
 0x626   :  { %6447 = vmatprep.subr.mxu1 %v6948_v1  ;;  %6458 = vmatprep.subr.mxu0 %v6948_v1 }
 0x627   :  { %6448 = vmatpush3.msra.mxu1 %v7088_v25  ;;  %6459 = vmatpush3.msra.mxu0 %v7190_v49  ;;  %v7407_v18 = vrot.slane %v7127_v36, %v1480_v48 }
 0x628   :  { %6449 = vmatprep.subr.mxu1 %v6948_v1  ;;  %6460 = vmatprep.subr.mxu0 %v6948_v1 }
 0x629   :  { %6450 = vmatpush3.msra.mxu1 %v7098_v27  ;;  %6461 = vmatpush3.msra.mxu0 %v7199_v50 }
 0x62a   :  { %6451 = vmatprep.subr.mxu1 %v6948_v1  ;;  %6462 = vmatprep.subr.mxu0 %v6948_v1 }
 0x62b   :  { %6452 = vmatpush3.msra.mxu1 %v7112_v29  ;;  %6453 = vmatprep.mubr.msk.f32.mxu1 %vm6949_vm0, %v6948_v1 }
 0x62c   :  { %6463 = vmatpush3.msra.mxu0 %v7206_v51  ;;  %6464 = vmatprep.mubr.msk.f32.mxu0 %vm6949_vm0, %v6948_v1 }
 0x62d   :  { %6454 = vmatmul.mubr.msk.f32.vlgmr.msra.gmra.mxu1 %vm138_vm5, %v1489_v17  ;;  %6465 = vmatmul.mubr.msk.f32.vlgmr.msra.gmra.mxu0 %vm138_vm5, %v1489_v17 }
 0x62e   :  { %6472 = vmatprep.subr.mxu0 %v6948_v1  ;;  %6467 = vmatprep.subr.mxu1 %v6948_v1 }
 0x62f   :  { %6469 = vmatprep.mubr.msk.f32.mxu1 %vm6949_vm0, %v6948_v1  ;;  %6474 = vmatprep.mubr.msk.f32.mxu0 %vm6949_vm0, %v6948_v1 }
 0x6c4   :  { %v1247_v23 = vpop.f32.mrf.mxu1 }
 0x6c5   :  { %v1471_v46 = vsel %vm1470_vm12, %v1247_v23, 0.0 }
 0x6c6   :  { %v6407_v25 = vpop.f32.mrf.mxu1 }
 0x6c9   :  { %v1393_v27 = vpop.f32.mrf.mxu1 }
 0x6ca   :  { %v1474_v49 = vsel %vm1470_vm12, %v1393_v27, 0.0 }
 0x6cb   :  { %v6417_v29 = vpop.f32.mrf.mxu1 }
 0x6cc   :  { %v1320_v38 = vpop.f32.mrf.mxu0 }
 0x6cd   :  { %v1472_v41 = vsel %vm1470_vm12, %v1320_v38, 0.0 }
 0x6ce   :  { %v6412_v43 = vpop.f32.mrf.mxu0  ;;  %v1473_v47 = vadd.f32 %v1472_v41, %v1471_v46 }
 0x6d0   :  { %v1475_v51 = vadd.f32 %v1474_v49, %v1473_v47 }
 0x6d4   :  { %v1466_v50 = vpop.f32.mrf.mxu0 }
 0x6d5   :  { %v1476_v19 = vsel %vm1470_vm12, %v1466_v50, 0.0 }
 0x6d6   :  { %v1477_v20 = vadd.f32 %v1476_v19, %v1475_v51  ;;  %v6422_v21 = vpop.f32.mrf.mxu0 }
 0x6d8   :  { %v1482_v3 = vadd.f32 %v7407_v18, %v1477_v20 }
 0x6da   :  { %v1483_v57 = vadd.f32 %v1482_v3, %v7059_v15 }
 0x6dc   :  { %1484 = vst.msk [vmem:[#allocation2] sm:$0x1f] %vm1470_vm12, %v1483_v57 }
 0x6e4   :  { %v1558_v30 = vpop.f32.mrf.mxu1  ;;  %v1628_v31 = vpop.f32.mrf.mxu0 }
 0x6e5   :  { %v1559_v32 = vadd.f32 %v7219_v52, %v1558_v30  ;;  %v1629_v33 = vadd.f32 %v7236_v60, %v1628_v31 }
 0x6e6   :  { %v6433_v39 = vpop.f32.mrf.mxu1  ;;  %v6444_v40 = vpop.f32.mrf.mxu0 }
 0x6e7   :  { %1850 = vrot.lane.b32.xlu1 %v1629_v33, %s6950_s12  ;;  %1773 = vrot.lane.b32.xlu0 %v1559_v32, %s6950_s12 }
 0x6ed   :  { %v1698_v42 = vpop.f32.mrf.mxu1  ;;  %v1768_v54 = vpop.f32.mrf.mxu0 }
 0x6ee   :  { %v7418_v55 = vadd.f32 %v7224_v53, %v1698_v42  ;;  %v7421_v58 = vadd.f32 %v7243_v0, %v1768_v54 }
 0x6ef   :  { %v6455_v59 = vpop.f32.mrf.mxu1  ;;  %v6466_v61 = vpop.f32.mrf.mxu0 }
 0x6f0   :  { %2004 = vrot.lane.b32.xlu0 %v7421_v58, %s6950_s12  ;;  %1927 = vrot.lane.b32.xlu1 %v7418_v55, %s6950_s12 }
 0x759   :  { %v1851_v52 = vpop.permute.xlu1 %1850  ;;  %v1774_v60 = vpop.permute.xlu0 %1773 }
 0x75a   :  { %6468 = vmatpush3.xpose.msk.msra.mxu1 %vm513_vm6, %v1774_v60  ;;  %6473 = vmatpush3.xpose.msk.msra.mxu0 %vm513_vm6, %v1851_v52 }
 0x75b   :  { %6477 = vmatprep.subr.mxu1 %v6948_v1  ;;  %6482 = vmatprep.subr.mxu0 %v6948_v1 }
 0x75d   :  { %6470 = vmatmul.mubr.msk.f32.vlgmr.msra.gmra.mxu1 %vm513_vm6, %v1559_v32  ;;  %6475 = vmatmul.mubr.msk.f32.vlgmr.msra.gmra.mxu0 %vm513_vm6, %v1629_v33 }
 0x75e   :  { %6479 = vmatprep.mubr.msk.f32.mxu1 %vm6949_vm0, %v6948_v1  ;;  %6484 = vmatprep.mubr.msk.f32.mxu0 %vm6949_vm0, %v6948_v1 }
 0x762   :  { %v2005_v53 = vpop.permute.xlu0 %2004  ;;  %v1928_v0 = vpop.permute.xlu1 %1927 }
 0x763   :  { %6478 = vmatpush3.xpose.msk.msra.mxu1 %vm513_vm6, %v1928_v0  ;;  %6483 = vmatpush3.xpose.msk.msra.mxu0 %vm513_vm6, %v2005_v53 }
 0x764   :  { %6487 = vmatprep.subr.mxu1 %v6948_v1  ;;  %6492 = vmatprep.subr.mxu0 %v6948_v1 }
 0x766   :  { %6480 = vmatmul.mubr.msk.f32.vlgmr.msra.gmra.mxu1 %vm513_vm6, %v7418_v55  ;;  %6485 = vmatmul.mubr.msk.f32.vlgmr.msra.gmra.mxu0 %vm513_vm6, %v7421_v58 }
 0x767   :  { %6489 = vmatprep.mubr.msk.f32.mxu1 %vm6949_vm0, %v6948_v1  ;;  %6494 = vmatprep.mubr.msk.f32.mxu0 %vm6949_vm0, %v6948_v1 }
 0x81d   :  { %v1845_v62 = vpop.f32.mrf.mxu1  ;;  %v1922_v4 = vpop.f32.mrf.mxu0 }
 0x81e   :  { %v2080_v5 = vmul.f32 0.35355338, %v1845_v62  ;;  %v2081_v6 = vmul.f32 0.35355338, %v1922_v4 }
 0x81f   :  { %v6471_v7 = vpop.f32.mrf.mxu1  ;;  %v6476_v8 = vpop.f32.mrf.mxu0 }
 0x820   :  { %v2087_v10 = vsel %vm823_vm7, %v2081_v6, -inf  ;;  %v2084_v11 = vsel %vm823_vm7, %v2080_v5, -inf }
 0x821   :  { %2088 = vmax.xlane.f32.xlu0 %v2087_v10  ;;  %2085 = vmax.xlane.f32.xlu1 %v2084_v11 }
 0x826   :  { %v1999_v12 = vpop.f32.mrf.mxu1  ;;  %v2076_v22 = vpop.f32.mrf.mxu0 }
 0x827   :  { %v2082_v24 = vmul.f32 0.35355338, %v1999_v12  ;;  %v2083_v26 = vmul.f32 0.35355338, %v2076_v22 }
 0x828   :  { %v6481_v28 = vpop.f32.mrf.mxu1  ;;  %v6486_v44 = vpop.f32.mrf.mxu0 }
 0x829   :  { %v2093_v13 = vsel %vm823_vm7, %v2083_v26, -inf  ;;  %v2090_v16 = vsel %vm823_vm7, %v2082_v24, -inf }
 0x82a   :  { %2094 = vmax.xlane.f32.xlu1 %v2093_v13  ;;  %2091 = vmax.xlane.f32.xlu0 %v2090_v16 }
 0x83b   :  { %2205 = vrot.lane.b32.xlu1 %v1629_v33, %s6951_s15 }
 0x840   :  { %2128 = vrot.lane.b32.xlu0 %v1559_v32, %s6951_s15 }
 0x8aa   :  { %v2089_v45 = vpop.xlane.xlu0 %2088  ;;  %v2086_v17 = vpop.xlane.xlu1 %2085 }
 0x8ab   :  { %v2097_v23 = vsub.f32 %v2081_v6, %v2089_v45  ;;  %v2096_v25 = vsub.f32 %v2080_v5, %v2086_v17 }
 0x8ad   :  { %v2102_v27 = vmul.f32 1.442695, %v2097_v23  ;;  %v2100_v29 = vmul.f32 1.442695, %v2096_v25 }
 0x8af   :  { %6852 = vpow2.f32 %v2102_v27 }
 0x8b0   :  { %6854 = vpow2.f32 %v2100_v29 }
 0x8b3   :  { %v2095_v38 = vpop.xlane.xlu1 %2094  ;;  %v2092_v41 = vpop.xlane.xlu0 %2091 }
 0x8b4   :  { %v2099_v43 = vsub.f32 %v2083_v26, %v2095_v38  ;;  %v2098_v46 = vsub.f32 %v2082_v24, %v2092_v41 }
 0x8b6   :  { %v2106_v47 = vmul.f32 1.442695, %v2099_v43  ;;  %v2104_v49 = vmul.f32 1.442695, %v2098_v46 }
 0x8b7   :  { %v2206_v50 = vpop.permute.xlu1 %2205  ;;  %v2129_v51 = vpop.permute.xlu0 %2128 }
 0x8b8   :  { %6856 = vpow2.f32 %v2106_v47  ;;  %6488 = vmatpush3.msk.msra.mxu1 %vm874_vm8, %v2129_v51  ;;  %6493 = vmatpush3.msk.msra.mxu0 %vm874_vm8, %v2206_v50 }
 0x8b9   :  { %6858 = vpow2.f32 %v2104_v49  ;;  %6497 = vmatprep.subr.mxu1 %v6948_v1  ;;  %6502 = vmatprep.subr.mxu0 %v6948_v1 }
 0x8bc   :  { %v6853_v19 = vpop.eup %6852 }
 0x8bd   :  { %v6855_v20 = vpop.eup %6854  ;;  %v2111_v21 = vsel %vm823_vm7, %v6853_v19, 0.0 }
 0x8be   :  { %2112 = vadd.xlane.f32.xlu1 %v2111_v21  ;;  %v2108_v3 = vsel %vm823_vm7, %v6855_v20, 0.0 }
 0x8bf   :  { %2109 = vadd.xlane.f32.xlu0 %v2108_v3 }
 0x8c5   :  { %v6857_v57 = vpop.eup %6856 }
 0x8c6   :  { %v6859_v30 = vpop.eup %6858  ;;  %v2117_v31 = vsel %vm823_vm7, %v6857_v57, 0.0 }
 0x8c7   :  { %2118 = vadd.xlane.f32.xlu1 %v2117_v31  ;;  %v2114_v32 = vsel %vm823_vm7, %v6859_v30, 0.0  ;;  %v2786_v31 = vld [vmem:[%s8166_s7 + $0x10] sm:$0xff] }
 0x8c8   :  { %2115 = vadd.xlane.f32.xlu0 %v2114_v32  ;;  %v2785_v32 = vld [vmem:[%s8166_s7 + $0x8] sm:$0xff] }
 0x8d8   :  { %2282 = vrot.lane.b32.xlu1 %v7418_v55, %s6951_s15 }
 0x8de   :  { %2359 = vrot.lane.b32.xlu0 %v7421_v58, %s6951_s15 }
 0x947   :  { %v2113_v33 = vpop.xlane.xlu1 %2112 }
 0x948   :  { %6860 = vrcp.f32 %v2113_v33  ;;  %v2110_v39 = vpop.xlane.xlu0 %2109  ;;  %v2784_v33 = vld [vmem:[%s8166_s7] sm:$0xff] }
 0x949   :  { %6862 = vrcp.f32 %v2110_v39  ;;  %v2901_v39 = vld [vmem:[%s8168_s9 + $0x78] sm:$0xff] }
 0x950   :  { %v2119_v40 = vpop.xlane.xlu1 %2118 }
 0x951   :  { %6864 = vrcp.f32 %v2119_v40  ;;  %v2116_v42 = vpop.xlane.xlu0 %2115  ;;  %v2900_v40 = vld [vmem:[%s8168_s9 + $0x70] sm:$0xff] }
 0x952   :  { %6866 = vrcp.f32 %v2116_v42  ;;  %v2899_v42 = vld [vmem:[%s8168_s9 + $0x68] sm:$0xff] }
 0x954   :  { %v2283_v53 = vpop.permute.xlu1 %2282 }
 0x955   :  { %v6861_v54 = vpop.eup %6860  ;;  %v2360_v60 = vpop.permute.xlu0 %2359 }
 0x956   :  { %v6863_v59 = vpop.eup %6862  ;;  %v2125_v61 = vmul.f32 %v6861_v54, %v6853_v19 }
 0x957   :  { %v2124_v52 = vmul.f32 %v6863_v59, %v6855_v20 }
 0x958   :  { %6495 = vmatmul.mubr.msk.f32.vlgmr.msra.gmra.mxu0 %vm870_vm10, %v2125_v61 }
 0x959   :  { %6490 = vmatmul.mubr.msk.f32.vlgmr.msra.gmra.mxu1 %vm870_vm10, %v2124_v52  ;;  %6503 = vmatpush3.msk.msra.mxu0 %vm874_vm8, %v2360_v60 }
 0x95a   :  { %6498 = vmatpush3.msk.msra.mxu1 %vm874_vm8, %v2283_v53  ;;  %6499 = vmatprep.mubr.msk.f32.mxu1 %vm6949_vm0, %v6948_v1 }
 0x95b   :  { %6504 = vmatprep.mubr.msk.f32.mxu0 %vm6949_vm0, %v6948_v1  ;;  %6507 = vmatprep.subr.mxu1 %v6948_v1 }
 0x95c   :  { %6512 = vmatprep.subr.mxu0 %v6948_v1 }
 0x95e   :  { %v6865_v55 = vpop.eup %6864 }
 0x95f   :  { %v6867_v58 = vpop.eup %6866  ;;  %v2127_v0 = vmul.f32 %v6865_v55, %v6857_v57  ;;  %v2774_v55 = vsub.s32 3, %v7121_v34 }
 0x960   :  { %v2126_v62 = vmul.f32 %v6867_v58, %v6859_v30  ;;  %v2787_v30 = vld [vmem:[%s8166_s7 + $0x18] sm:$0xff]  ;;  %v2780_v58 = vsub.s32 4, %v7121_v34 }
 0x961   :  { %6505 = vmatmul.mubr.msk.f32.vlgmr.msra.gmra.mxu0 %vm870_vm10, %v2127_v0  ;;  %v2775_v0 = vrot.slane %v7127_v36, %v2774_v55 }
 0x962   :  { %6500 = vmatmul.mubr.msk.f32.vlgmr.msra.gmra.mxu1 %vm870_vm10, %v2126_v62  ;;  %6513 = vmatpush3.msra.mxu0 %v7322_v2 }
 0x963   :  { %6508 = vmatpush3.msra.mxu1 %v7315_v63  ;;  %6509 = vmatprep.mubr.msk.f32.mxu1 %vm6949_vm0, %v6948_v1 }
 0x964   :  { %6514 = vmatprep.mubr.msk.f32.mxu0 %vm6949_vm0, %v6948_v1  ;;  %6517 = vmatprep.subr.mxu1 %v6948_v1 }
 0x965   :  { %6522 = vmatprep.subr.mxu0 %v6948_v1 }
 0xa18   :  { %v2278_v4 = vpop.f32.mrf.mxu0 }
 0xa19   :  { %v2201_v5 = vpop.f32.mrf.mxu1  ;;  %6515 = vmatmul.mubr.msk.f32.vlgmr.msra.gmra.mxu0 %vm513_vm6, %v2278_v4 }
 0xa1a   :  { %6510 = vmatmul.mubr.msk.f32.vlgmr.msra.gmra.mxu1 %vm513_vm6, %v2201_v5  ;;  %v6496_v6 = vpop.f32.mrf.mxu0  ;;  %6523 = vmatpush3.msra.mxu0 %v7340_v9 }
 0xa1b   :  { %v6491_v63 = vpop.f32.mrf.mxu1  ;;  %6518 = vmatpush3.msra.mxu1 %v7329_v56  ;;  %6519 = vmatprep.mubr.msk.f32.mxu1 %vm6949_vm0, %v6948_v1  ;;  %v2781_v6 = vrot.slane %v7127_v36, %v2780_v58  ;;  %v2897_v36 = vld [vmem:[%s8168_s9 + $0x58] sm:$0xff] }
 0xa1c   :  { %6524 = vmatprep.mubr.msk.f32.mxu0 %vm6949_vm0, %v6948_v1  ;;  %6527 = vmatprep.subr.mxu1 %v2787_v30 }
 0xa1d   :  { %6538 = vmatprep.subr.mxu0 %v2901_v39 }
 0xa21   :  { %v2432_v2 = vpop.f32.mrf.mxu0 }
 0xa22   :  { %v2355_v7 = vpop.f32.mrf.mxu1  ;;  %6525 = vmatmul.mubr.msk.f32.vlgmr.msra.gmra.mxu0 %vm513_vm6, %v2432_v2 }
 0xa23   :  { %6520 = vmatmul.mubr.msk.f32.vlgmr.msra.gmra.mxu1 %vm513_vm6, %v2355_v7  ;;  %v6506_v8 = vpop.f32.mrf.mxu0  ;;  %6539 = vmatpush3.msra.mxu0 %v2901_v39 }
 0xa24   :  { %v6501_v10 = vpop.f32.mrf.mxu1  ;;  %6528 = vmatpush3.msra.mxu1 %v2787_v30  ;;  %6540 = vmatprep.subr.mxu0 %v2900_v40 }
 0xa25   :  { %6529 = vmatprep.subr.mxu1 %v2786_v31  ;;  %6541 = vmatpush3.msra.mxu0 %v2900_v40 }
 0xa26   :  { %6530 = vmatpush3.msra.mxu1 %v2786_v31  ;;  %6542 = vmatprep.subr.mxu0 %v2899_v42 }
 0xa27   :  { %6531 = vmatprep.subr.mxu1 %v2785_v32  ;;  %6543 = vmatpush3.msra.mxu0 %v2899_v42 }
 0xa28   :  { %6532 = vmatpush3.msra.mxu1 %v2785_v32 }
 0xa29   :  { %6533 = vmatprep.subr.mxu1 %v2784_v33 }
 0xa2a   :  { %6534 = vmatpush3.msra.mxu1 %v2784_v33 }
 0xa2b   :  { %6573 = vmatprep.subr.mxu1 %v6948_v1 }
 0xad9   :  { %v2578_v11 = vpop.f32.mrf.mxu0 }
 0xada   :  { %v2505_v12 = vpop.f32.mrf.mxu1  ;;  %v2729_v24 = vsel %vm1470_vm12, %v2578_v11, 0.0  ;;  %v2898_v11 = vld [vmem:[%s8168_s9 + $0x60] sm:$0xff] }
 0xadb   :  { %v6516_v9 = vpop.f32.mrf.mxu0  ;;  %v2728_v56 = vsel %vm1470_vm12, %v2505_v12, 0.0  ;;  %6544 = vmatprep.subr.mxu0 %v2898_v11  ;;  %v2896_v12 = vld [vmem:[%s8168_s9 + $0x50] sm:$0xff] }
 0xadc   :  { %v6511_v22 = vpop.f32.mrf.mxu1  ;;  %v2730_v28 = vadd.f32 %v2729_v24, %v2728_v56  ;;  %6545 = vmatpush3.msra.mxu0 %v2898_v11  ;;  %v2895_v9 = vld [vmem:[%s8168_s9 + $0x48] sm:$0xff]  ;;  %v2893_v56 = vld [vmem:[%s8168_s9 + $0x38] sm:$0xff]  ;;  %v2892_v24 = vld [vmem:[%s8168_s9 + $0x30] sm:$0xff] }
 0xadd   :  { %6546 = vmatprep.subr.mxu0 %v2897_v36  ;;  %v2894_v22 = vld [vmem:[%s8168_s9 + $0x40] sm:$0xff] }
 0xade   :  { %6547 = vmatpush3.msra.mxu0 %v2897_v36  ;;  %v7663_v36 = vld [vmem:[%s8163_s4 + $0xb8] sm:$0xff] }
 0xadf   :  { %6548 = vmatprep.subr.mxu0 %v2896_v12 }
 0xae0   :  { %6549 = vmatpush3.msra.mxu0 %v2896_v12  ;;  %v7686_v12 = vld [vmem:[%s8163_s4 + $0xa0] sm:$0xff] }
 0xae1   :  { %6550 = vmatprep.subr.mxu0 %v2895_v9 }
 0xae2   :  { %v2724_v26 = vpop.f32.mrf.mxu0  ;;  %6551 = vmatpush3.msra.mxu0 %v2895_v9  ;;  %v7693_v9 = vld [vmem:[%s8163_s4 + $0xd8] sm:$0xff] }
 0xae3   :  { %v2651_v44 = vpop.f32.mrf.mxu1  ;;  %v2733_v23 = vsel %vm1470_vm12, %v2724_v26, 0.0  ;;  %6552 = vmatprep.subr.mxu0 %v2894_v22  ;;  %v2891_v26 = vld [vmem:[%s8168_s9 + $0x28] sm:$0xff] }
 0xae4   :  { %v2731_v13 = vsel %vm1470_vm12, %v2651_v44, 0.0  ;;  %v6526_v16 = vpop.f32.mrf.mxu0  ;;  %6553 = vmatpush3.msra.mxu0 %v2894_v22  ;;  %v2889_v44 = vld [vmem:[%s8168_s9 + $0x18] sm:$0xff]  ;;  %v7702_v22 = vld [vmem:[%s8163_s4 + $0xd0] sm:$0xff] }
 0xae5   :  { %v2732_v45 = vadd.f32 %v2731_v13, %v2730_v28  ;;  %v6521_v17 = vpop.f32.mrf.mxu1  ;;  %6554 = vmatprep.subr.mxu0 %v2893_v56  ;;  %v2890_v28 = vld [vmem:[%s8168_s9 + $0x20] sm:$0xff]  ;;  %v2888_v13 = vld [vmem:[%s8168_s9 + $0x10] sm:$0xff]  ;;  %v2887_v16 = vld [vmem:[%s8168_s9 + $0x8] sm:$0xff] }
 0xae6   :  { %6555 = vmatpush3.msra.mxu0 %v2893_v56  ;;  %v5967_v17 = vld [vmem:[%s8167_s8] ss:$0 sm:$0xff]  ;;  %v7711_v56 = vld [vmem:[%s8163_s4 + $0xc8] sm:$0xff] }
 0xae7   :  { %v2734_v25 = vadd.f32 %v2733_v23, %v2732_v45  ;;  %6556 = vmatprep.subr.mxu0 %v2892_v24  ;;  %v2886_v45 = vld [vmem:[%s8168_s9] sm:$0xff] }
 0xae8   :  { %6557 = vmatpush3.msra.mxu0 %v2892_v24  ;;  %v7718_v24 = vld [vmem:[%s8163_s4 + $0xc0] sm:$0xff] }
 0xae9   :  { %v2735_v27 = vadd.f32 %v2734_v25, %v7407_v18  ;;  %6558 = vmatprep.subr.mxu0 %v2891_v26 }
 0xaea   :  { %6559 = vmatpush3.msra.mxu0 %v2891_v26  ;;  %v7725_v26 = vld [vmem:[%s8163_s4 + $0xf8] sm:$0xff] }
 0xaeb   :  { %v2737_v29 = vrot.slane %v2735_v27, 3  ;;  %6560 = vmatprep.subr.mxu0 %v2890_v28 }
 0xaec   :  { %6561 = vmatpush3.msra.mxu0 %v2890_v28  ;;  %v7734_v28 = vld [vmem:[%s8163_s4 + $0xf0] sm:$0xff] }
 0xaed   :  { %v2739_v38 = vadd.f32 %v2737_v29, %v7059_v15  ;;  %v2740_v41 = vadd.f32 %v2737_v29, %v7290_v14  ;;  %6562 = vmatprep.subr.mxu0 %v2889_v44 }
 0xaee   :  { %6563 = vmatpush3.msra.mxu0 %v2889_v44  ;;  %v7743_v44 = vld [vmem:[%s8163_s4 + $0xe8] sm:$0xff] }
 0xaef   :  { %2742 = vst.msk [vmem:[#allocation2] sm:$0xe0] %vm2741_vm13, %v2739_v38  ;;  %6564 = vmatprep.subr.mxu0 %v2888_v13 }
 0xaf0   :  { %2743 = vst.msk [vmem:[#allocation2 + $0x8] sm:$0x3] %vm142_vm9, %v2740_v41  ;;  %6565 = vmatpush3.msra.mxu0 %v2888_v13  ;;  %v7750_v13 = vld [vmem:[%s8163_s4 + $0xe0] sm:$0xff] }
 0xaf1   :  { %6566 = vmatprep.subr.mxu0 %v2887_v16 }
 0xaf2   :  { %6567 = vmatpush3.msra.mxu0 %v2887_v16  ;;  %v7763_v16 = vld [vmem:[%s8164_s5 + $0x4] ss:$0 sm:$0xff] }
 0xaf3   :  { %6568 = vmatprep.subr.mxu0 %v2886_v45 }
 0xaf4   :  { %6569 = vmatpush3.msra.mxu0 %v2886_v45 }
 0xaf5   :  { %6617 = vmatprep.subr.mxu0 %v6948_v1 }
 0xaf6   :  { %v7508_v46 = vld [vmem:[#allocation2] sm:$0xff] }
 0xaf7   :  { %v7506_v43 = vld [vmem:[#allocation2 + $0x8] sm:$0x3]  ;;  %v2746_v18 = vsel %vm138_vm5, %v7508_v46, 0.0 }
 0xaf8   :  { %v2749_v47 = vsel %vm142_vm9, %v7506_v43, 0.0  ;;  %2747 = vadd.xlane.f32.xlu1 %v2746_v18 }
 0xaf9   :  { %2750 = vadd.xlane.f32.xlu0 %v2749_v47 }
 0xb81   :  { %v2748_v15 = vpop.xlane.xlu1 %2747 }
 0xb82   :  { %v2751_v49 = vpop.xlane.xlu0 %2750  ;;  %v2752_v14 = vmul.f32 0.03125, %v2748_v15 }
 0xb83   :  { %v2753_v50 = vmul.f32 0.03125, %v2751_v49 }
 0xb84   :  { %v2754_v19 = vsub.f32 %v7508_v46, %v2752_v14 }
 0xb85   :  { %v2755_v51 = vsub.f32 %v7506_v43, %v2753_v50 }
 0xb86   :  { %v2756_v21 = vmul.f32 %v2754_v19, %v2754_v19 }
 0xb87   :  { %v2757_v20 = vmul.f32 %v2755_v51, %v2755_v51 }
 0xb88   :  { %v2758_v57 = vsel %vm138_vm5, %v2756_v21, 0.0  ;;  %v6924_v21 = vld [vmem:[%s8169_s10] sm:$0x3f] }
 0xb89   :  { %v2761_v3 = vsel %vm142_vm9, %v2757_v20, 0.0  ;;  %2759 = vadd.xlane.f32.xlu0 %v2758_v57  ;;  %v2904_v20 = vsub.s32 5, %v7121_v34 }
 0xb8a   :  { %2762 = vadd.xlane.f32.xlu1 %v2761_v3 }
 0xb8b   :  { %v2905_v3 = vrot.slane %v6924_v21, %v2904_v20 }
 0xc12   :  { %v2760_v54 = vpop.xlane.xlu0 %2759 }
 0xc13   :  { %v2763_v59 = vpop.xlane.xlu1 %2762  ;;  %v2764_v61 = vmul.f32 0.03125, %v2760_v54 }
 0xc14   :  { %v2765_v52 = vmul.f32 0.03125, %v2763_v59 }
 0xc15   :  { %v2766_v60 = vadd.f32 1e-12, %v2764_v61 }
 0xc16   :  { %v2767_v53 = vadd.f32 1e-12, %v2765_v52 }
 0xc17   :  { %6868 = vrsqrt.f32 %v2766_v60  ;;  %v7623_v60 = vld [vmem:[%s8163_s4 + $0x90] sm:$0xff] }
 0xc18   :  { %6870 = vrsqrt.f32 %v2767_v53  ;;  %v7628_v53 = vld [vmem:[%s8163_s4 + $0x88] sm:$0xff] }
 0xc24   :  { %v6869_v62 = vpop.eup %6868 }
 0xc25   :  { %v6871_v4 = vpop.eup %6870  ;;  %v2770_v5 = vmul.f32 %v6869_v62, %v2754_v19 }
 0xc26   :  { %v2771_v63 = vmul.f32 %v6871_v4, %v2755_v51 }
 0xc27   :  { %v2776_v2 = vmul.f32 %v2775_v0, %v2770_v5 }
 0xc28   :  { %v2777_v7 = vmul.f32 %v2775_v0, %v2771_v63  ;;  %v7635_v0 = vld [vmem:[%s8163_s4 + $0x80] sm:$0xff] }
 0xc29   :  { %v2782_v8 = vadd.f32 %v2781_v6, %v2776_v2 }
 0xc2a   :  { %v2783_v10 = vadd.f32 %v2781_v6, %v2777_v7  ;;  %v7644_v6 = vld [vmem:[%s8169_s10 + $0x8] sm:$0x3f] }
 0xc2b   :  { %6535 = vmatprep.mubr.msk.f32.mxu1 %vm138_vm5, %v2782_v8  ;;  %v7649_v63 = vrot.slane %v7644_v6, %v169_v35  ;;  %v7654_v8 = vrot.slane %v7644_v6, %v175_v37  ;;  %v7670_v35 = vld [vmem:[%s8163_s4 + $0xb0] sm:$0xff]  ;;  %v7679_v37 = vld [vmem:[%s8163_s4 + $0xa8] sm:$0xff] }
 0xc2c   :  { %6536 = vmatmul.mubr.msk.f32.vlgmr.msra.gmra.mxu1 %vm138_vm5, %v2783_v10 }
 0xc2d   :  { %6581 = vmatprep.mubr.msk.f32.mxu1 %vm6949_vm0, %v6948_v1 }
 0xcec   :  { %v6537_v23 = vpop.f32.mrf.mxu1 }
 0xced   :  { %v2873_v25 = vadd.f32 %v6537_v23, %v5967_v17 }
 0xcee   :  { %v2867_v27 = vpop.f32.mrf.mxu1 }
 0xcef   :  { %v2879_v29 = vmul.f32 0.70710677, %v2873_v25  ;;  %v2868_v38 = vadd.f32 %v5967_v17, %v2867_v27  ;;  %v2877_v14 = vmul.f32 0.5, %v2873_v25  ;;  %v7770_v25 = vld [vmem:[%s8164_s5 + $0x5] ss:$0 sm:$0xff] }
 0xcf1   :  { %6872 = verf.f32 %v2879_v29  ;;  %v2878_v41 = vmul.f32 0.70710677, %v2868_v38  ;;  %v2876_v15 = vmul.f32 0.5, %v2868_v38 }
 0xcf3   :  { %6874 = verf.f32 %v2878_v41  ;;  %v7777_v41 = vld [vmem:[%s8164_s5 + $0x6] ss:$0 sm:$0xff] }
 0xcfe   :  { %v6873_v47 = vpop.eup %6872 }
 0xcff   :  { %v2883_v49 = vadd.f32 1.0, %v6873_v47 }
 0xd00   :  { %v6875_v18 = vpop.eup %6874 }
 0xd01   :  { %v2882_v50 = vadd.f32 1.0, %v6875_v18  ;;  %v2885_v19 = vmul.f32 %v2883_v49, %v2877_v14 }
 0xd03   :  { %v2884_v51 = vmul.f32 %v2882_v50, %v2876_v15  ;;  %v7787_v15 = vld [vmem:[%s8164_s5 + $0x7] ss:$0 sm:$0xff] }
 0xd05   :  { %6570 = vmatprep.mubr.f32.mxu0 %v2884_v51 }
 0xd06   :  { %6571 = vmatmul.mubr.f32.vlgmr.msra.gmra.mxu0 %v2885_v19 }
 0xd07   :  { %6619 = vmatprep.mubr.msk.f32.mxu0 %vm6949_vm0, %v6948_v1 }
 0xdc6   :  { %v6572_v57 = vpop.f32.mrf.mxu0 }
 0xdc7   :  { %v2978_v30 = vadd.f32 %v6572_v57, %v2905_v3 }
 0xdc8   :  { %v2972_v31 = vpop.f32.mrf.mxu0 }
 0xdc9   :  { %v2982_v32 = vadd.f32 %v2978_v30, %v7506_v43  ;;  %v2973_v33 = vadd.f32 %v2972_v31, %v2905_v3 }
 0xdcb   :  { %2984 = vst.msk [vmem:[#allocation2 + $0x8] sm:$0x3] %vm142_vm9, %v2982_v32  ;;  %v2981_v39 = vadd.f32 %v2973_v33, %v7508_v46  ;;  %v7616_v46 = vld [vmem:[%s8163_s4 + $0x98] sm:$0xff] }
 0xdcc   :  { %6574 = vmatpush3.msra.mxu1 %v7616_v46 }
 0xdcd   :  { %2983 = vst.msk [vmem:[#allocation2] sm:$0xff] %vm138_vm5, %v2981_v39  ;;  %6575 = vmatprep.subr.mxu1 %v6948_v1 }
 0xdce   :  { %6576 = vmatpush3.msra.mxu1 %v7623_v60 }
 0xdcf   :  { %6577 = vmatprep.subr.mxu1 %v6948_v1 }
 0xdd0   :  { %6578 = vmatpush3.msra.mxu1 %v7628_v53 }
 0xdd1   :  { %6579 = vmatprep.subr.mxu1 %v6948_v1 }
 0xdd2   :  { %6580 = vmatpush3.msra.mxu1 %v7635_v0 }
 0xdd3   :  { %6584 = vmatprep.subr.mxu1 %v6948_v1 }
 0xdd4   :  { %v7607_v40 = vld [vmem:[#allocation2] sm:$0xff] }
 0xdd5   :  { %v2989_v42 = vsel %vm138_vm5, %v7607_v40, 0.0 }
 0xdd6   :  { %2990 = vadd.xlane.f32.xlu0 %v2989_v42 }
 0xe5f   :  { %v2991_v54 = vpop.xlane.xlu0 %2990 }
 0xe60   :  { %v2995_v59 = vmul.f32 0.03125, %v2991_v54 }
 0xe62   :  { %v2997_v61 = vsub.f32 %v7607_v40, %v2995_v59 }
 0xe64   :  { %v2999_v52 = vmul.f32 %v2997_v61, %v2997_v61 }
 0xe66   :  { %v3001_v43 = vsel %vm138_vm5, %v2999_v52, 0.0 }
 0xe67   :  { %3002 = vadd.xlane.f32.xlu1 %v3001_v43 }
 0xef0   :  { %v3003_v62 = vpop.xlane.xlu1 %3002 }
 0xef1   :  { %v3007_v4 = vmul.f32 0.03125, %v3003_v62 }
 0xef3   :  { %v3009_v5 = vadd.f32 1e-12, %v3007_v4 }
 0xef5   :  { %6876 = vrsqrt.f32 %v3009_v5 }
 0xf02   :  { %v6877_v2 = vpop.eup %6876 }
 0xf03   :  { %v3013_v7 = vmul.f32 %v6877_v2, %v2997_v61 }
 0xf05   :  { %v3019_v10 = vmul.f32 %v7649_v63, %v3013_v7 }
 0xf07   :  { %v7658_v11 = vadd.f32 %v7654_v8, %v3019_v10 }
 0xf09   :  { %6582 = vmatmul.mubr.msk.f32.vlgmr.msra.gmra.mxu1 %vm138_vm5, %v7658_v11 }
 0xf0a   :  { %6585 = vmatpush3.msra.mxu1 %v7663_v36  ;;  %6592 = vmatprep.mubr.msk.f32.mxu1 %vm6949_vm0, %v6948_v1 }
 0xf0b   :  { %6586 = vmatprep.subr.mxu1 %v6948_v1 }
 0xf0c   :  { %6587 = vmatpush3.msra.mxu1 %v7670_v35 }
 0xf0d   :  { %6588 = vmatprep.subr.mxu1 %v6948_v1 }
 0xf0e   :  { %6589 = vmatpush3.msra.mxu1 %v7679_v37 }
 0xf0f   :  { %6590 = vmatprep.subr.mxu1 %v6948_v1 }
 0xf10   :  { %6591 = vmatpush3.msra.mxu1 %v7686_v12 }
 0xf11   :  { %6593 = vmatmul.mubr.msk.f32.vlgmr.msra.gmra.mxu1 %vm138_vm5, %v7658_v11  ;;  %6595 = vmatprep.subr.mxu1 %v6948_v1 }
 0xf12   :  { %6596 = vmatpush3.msra.mxu1 %v7693_v9  ;;  %6603 = vmatprep.mubr.msk.f32.mxu1 %vm6949_vm0, %v6948_v1 }
 0xf13   :  { %6597 = vmatprep.subr.mxu1 %v6948_v1 }
 0xf14   :  { %6598 = vmatpush3.msra.mxu1 %v7702_v22 }
 0xf15   :  { %6599 = vmatprep.subr.mxu1 %v6948_v1 }
 0xf16   :  { %6600 = vmatpush3.msra.mxu1 %v7711_v56 }
 0xf17   :  { %6601 = vmatprep.subr.mxu1 %v6948_v1 }
 0xf18   :  { %6602 = vmatpush3.msra.mxu1 %v7718_v24 }
 0xf19   :  { %6604 = vmatmul.mubr.msk.f32.vlgmr.msra.gmra.mxu1 %vm138_vm5, %v7658_v11  ;;  %6606 = vmatprep.subr.mxu1 %v6948_v1 }
 0xf1a   :  { %6607 = vmatpush3.msra.mxu1 %v7725_v26  ;;  %6614 = vmatprep.mubr.msk.f32.mxu1 %vm6949_vm0, %v6948_v1 }
 0xf1b   :  { %6608 = vmatprep.subr.mxu1 %v6948_v1 }
 0xf1c   :  { %6609 = vmatpush3.msra.mxu1 %v7734_v28 }
 0xf1d   :  { %6610 = vmatprep.subr.mxu1 %v6948_v1 }
 0xf1e   :  { %6611 = vmatpush3.msra.mxu1 %v7743_v44 }
 0xf1f   :  { %6612 = vmatprep.subr.mxu1 %v6948_v1 }
 0xf20   :  { %6613 = vmatpush3.msra.mxu1 %v7750_v13 }
 0xf21   :  { %6615 = vmatmul.mubr.msk.f32.vlgmr.msra.gmra.mxu1 %vm138_vm5, %v7658_v11  ;;  %6627 = vmatprep.subr.mxu1 %v6948_v1 }
 0xf22   :  { %6629 = vmatprep.mubr.msk.f32.mxu1 %vm6949_vm0, %v6948_v1 }
 0xfc9   :  { %v3147_v45 = vpop.f32.mrf.mxu1 }
 0xfca   :  { %v3148_v17 = vadd.f32 %v7763_v16, %v3147_v45 }
 0xfcb   :  { %v6583_v23 = vpop.f32.mrf.mxu1 }
 0xfcc   :  { %3362 = vrot.lane.b32.xlu0 %v3148_v17, %s6950_s12 }
 0xfd1   :  { %v3217_v27 = vpop.f32.mrf.mxu1 }
 0xfd2   :  { %v3218_v29 = vadd.f32 %v7770_v25, %v3217_v27 }
 0xfd3   :  { %v6594_v38 = vpop.f32.mrf.mxu1 }
 0xfd4   :  { %3439 = vrot.lane.b32.xlu1 %v3218_v29, %s6950_s12 }
 0xfd9   :  { %v3287_v47 = vpop.f32.mrf.mxu1 }
 0xfda   :  { %v7780_v18 = vadd.f32 %v7777_v41, %v3287_v47 }
 0xfdb   :  { %v6605_v49 = vpop.f32.mrf.mxu1 }
 0xfdc   :  { %3516 = vrot.lane.b32.xlu1 %v7780_v18, %s6950_s12 }
 0xfe1   :  { %v3357_v50 = vpop.f32.mrf.mxu1 }
 0xfe2   :  { %v7790_v14 = vadd.f32 %v7787_v15, %v3357_v50 }
 0xfe3   :  { %v6616_v51 = vpop.f32.mrf.mxu1 }
 0xfe4   :  { %3593 = vrot.lane.b32.xlu0 %v7790_v14, %s6950_s12 }
0x103e   :  { %v3363_v19 = vpop.permute.xlu0 %3362 }
0x103f   :  { %6618 = vmatpush3.xpose.msk.msra.mxu0 %vm513_vm6, %v3363_v19 }
0x1040   :  { %6622 = vmatprep.subr.mxu0 %v6948_v1 }
0x1042   :  { %6620 = vmatmul.mubr.msk.f32.vlgmr.msra.gmra.mxu0 %vm513_vm6, %v3148_v17 }
0x1043   :  { %6624 = vmatprep.mubr.msk.f32.mxu0 %vm6949_vm0, %v6948_v1 }
0x1046   :  { %v3440_v21 = vpop.permute.xlu1 %3439 }
0x1047   :  { %6623 = vmatpush3.xpose.msk.msra.mxu0 %vm513_vm6, %v3440_v21 }
0x1048   :  { %6632 = vmatprep.subr.mxu0 %v6948_v1 }
0x104a   :  { %6625 = vmatmul.mubr.msk.f32.vlgmr.msra.gmra.mxu0 %vm513_vm6, %v3218_v29 }
0x104b   :  { %6634 = vmatprep.mubr.msk.f32.mxu0 %vm6949_vm0, %v6948_v1 }
0x104e   :  { %v3517_v3 = vpop.permute.xlu1 %3516 }
0x104f   :  { %6628 = vmatpush3.xpose.msk.msra.mxu1 %vm513_vm6, %v3517_v3 }
0x1050   :  { %6637 = vmatprep.subr.mxu1 %v6948_v1 }
0x1052   :  { %6630 = vmatmul.mubr.msk.f32.vlgmr.msra.gmra.mxu1 %vm513_vm6, %v7780_v18 }
0x1053   :  { %6639 = vmatprep.mubr.msk.f32.mxu1 %vm6949_vm0, %v6948_v1 }
0x1056   :  { %v3594_v57 = vpop.permute.xlu0 %3593 }
0x1057   :  { %6633 = vmatpush3.xpose.msk.msra.mxu0 %vm513_vm6, %v3594_v57 }
0x1058   :  { %6642 = vmatprep.subr.mxu0 %v6948_v1 }
0x105a   :  { %6635 = vmatmul.mubr.msk.f32.vlgmr.msra.gmra.mxu0 %vm513_vm6, %v7790_v14 }
0x105b   :  { %6644 = vmatprep.mubr.msk.f32.mxu0 %vm6949_vm0, %v6948_v1 }
0x1102   :  { %v3434_v30 = vpop.f32.mrf.mxu0 }
0x1103   :  { %v3669_v31 = vmul.f32 0.35355338, %v3434_v30 }
0x1104   :  { %v6621_v32 = vpop.f32.mrf.mxu0 }
0x1105   :  { %v3673_v33 = vsel %vm823_vm7, %v3669_v31, -inf }
0x1106   :  { %3674 = vmax.xlane.f32.xlu1 %v3673_v33 }
0x110a   :  { %v3511_v39 = vpop.f32.mrf.mxu0 }
0x110b   :  { %v3670_v42 = vmul.f32 0.35355338, %v3511_v39 }
0x110c   :  { %v6626_v54 = vpop.f32.mrf.mxu0 }
0x110d   :  { %v3676_v59 = vsel %vm823_vm7, %v3670_v42, -inf }
0x110e   :  { %3677 = vmax.xlane.f32.xlu0 %v3676_v59  ;;  %v7834_v59 = vld [vmem:[#allocation2 + $0x8] sm:$0x3] }
0x1112   :  { %v3588_v61 = vpop.f32.mrf.mxu1 }
0x1113   :  { %v3671_v52 = vmul.f32 0.35355338, %v3588_v61  ;;  %v2992_v61 = vsel %vm142_vm9, %v7834_v59, 0.0 }
0x1114   :  { %v6631_v43 = vpop.f32.mrf.mxu1 }
0x1115   :  { %v3679_v62 = vsel %vm823_vm7, %v3671_v52, -inf }
0x1116   :  { %3680 = vmax.xlane.f32.xlu0 %v3679_v62 }
0x111a   :  { %v3665_v4 = vpop.f32.mrf.mxu0 }
0x111b   :  { %v3672_v5 = vmul.f32 0.35355338, %v3665_v4 }
0x111c   :  { %v6636_v2 = vpop.f32.mrf.mxu0 }
0x111d   :  { %v3682_v7 = vsel %vm823_vm7, %v3672_v5, -inf }
0x111e   :  { %3683 = vmax.xlane.f32.xlu1 %v3682_v7 }
0x112c   :  { %3717 = vrot.lane.b32.xlu0 %v3148_v17, %s6951_s15 }
0x112f   :  { %3794 = vrot.lane.b32.xlu1 %v3218_v29, %s6951_s15 }
0x118f   :  { %v3675_v10 = vpop.xlane.xlu1 %3674 }
0x1190   :  { %v3685_v45 = vsub.f32 %v3669_v31, %v3675_v10 }
0x1192   :  { %v3689_v23 = vmul.f32 1.442695, %v3685_v45 }
0x1194   :  { %6878 = vpow2.f32 %v3689_v23 }
0x1197   :  { %v3678_v27 = vpop.xlane.xlu0 %3677 }
0x1198   :  { %v3686_v38 = vsub.f32 %v3670_v42, %v3678_v27 }
0x119a   :  { %v3691_v47 = vmul.f32 1.442695, %v3686_v38 }
0x119c   :  { %6880 = vpow2.f32 %v3691_v47 }
0x119f   :  { %v3681_v49 = vpop.xlane.xlu0 %3680 }
0x11a0   :  { %v3687_v50 = vsub.f32 %v3671_v52, %v3681_v49 }
0x11a1   :  { %v6879_v51 = vpop.eup %6878 }
0x11a2   :  { %v3693_v19 = vmul.f32 1.442695, %v3687_v50  ;;  %v3697_v21 = vsel %vm823_vm7, %v6879_v51, 0.0 }
0x11a3   :  { %v3718_v3 = vpop.permute.xlu0 %3717  ;;  %3698 = vadd.xlane.f32.xlu0 %v3697_v21 }
0x11a4   :  { %6882 = vpow2.f32 %v3693_v19  ;;  %6638 = vmatpush3.msk.msra.mxu1 %vm874_vm8, %v3718_v3  ;;  %v7866_v3 = vld [vmem:[%s8165_s6 + $0x28] sm:$0xff] }
0x11a5   :  { %6647 = vmatprep.subr.mxu1 %v6948_v1 }
0x11a7   :  { %v3684_v17 = vpop.xlane.xlu1 %3683 }
0x11a8   :  { %v3688_v29 = vsub.f32 %v3672_v5, %v3684_v17  ;;  %v7873_v17 = vld [vmem:[%s8165_s6 + $0x30] sm:$0xff] }
0x11a9   :  { %v6881_v57 = vpop.eup %6880 }
0x11aa   :  { %v3695_v30 = vmul.f32 1.442695, %v3688_v29  ;;  %v3700_v31 = vsel %vm823_vm7, %v6881_v57, 0.0 }
0x11ab   :  { %v3795_v32 = vpop.permute.xlu1 %3794  ;;  %3701 = vadd.xlane.f32.xlu1 %v3700_v31 }
0x11ac   :  { %6884 = vpow2.f32 %v3695_v30  ;;  %6643 = vmatpush3.msk.msra.mxu0 %vm874_vm8, %v3795_v32  ;;  %v7883_v30 = vld [vmem:[%s8165_s6 + $0x38] sm:$0xff] }
0x11ad   :  { %6652 = vmatprep.subr.mxu0 %v6948_v1 }
0x11b1   :  { %v6883_v33 = vpop.eup %6882 }
0x11b2   :  { %v3703_v39 = vsel %vm823_vm7, %v6883_v33, 0.0 }
0x11b3   :  { %3704 = vadd.xlane.f32.xlu0 %v3703_v39 }
0x11b9   :  { %v6885_v42 = vpop.eup %6884 }
0x11ba   :  { %v3706_v54 = vsel %vm823_vm7, %v6885_v42, 0.0 }
0x11bb   :  { %3707 = vadd.xlane.f32.xlu1 %v3706_v54 }
0x11c9   :  { %3948 = vrot.lane.b32.xlu0 %v7790_v14, %s6951_s15 }
0x11cc   :  { %3871 = vrot.lane.b32.xlu1 %v7780_v18, %s6951_s15 }
0x11f0   :  { %2993 = vadd.xlane.f32.xlu1 %v2992_v61 }
0x122c   :  { %v3699_v52 = vpop.xlane.xlu0 %3698 }
0x122d   :  { %6886 = vrcp.f32 %v3699_v52 }
0x1234   :  { %v3702_v43 = vpop.xlane.xlu1 %3701 }
0x1235   :  { %6888 = vrcp.f32 %v3702_v43  ;;  %v4332_v43 = vrot.slane %v7658_v11, 5 }
0x123a   :  { %v6887_v62 = vpop.eup %6886 }
0x123b   :  { %v3713_v4 = vmul.f32 %v6887_v62, %v6879_v51  ;;  %v7858_v51 = vld [vmem:[%s8165_s6 + $0x20] sm:$0xff] }
0x123c   :  { %v3705_v5 = vpop.xlane.xlu0 %3704 }
0x123d   :  { %6890 = vrcp.f32 %v3705_v5  ;;  %6640 = vmatmul.mubr.msk.f32.vlgmr.msra.gmra.mxu1 %vm870_vm10, %v3713_v4 }
0x123e   :  { %6649 = vmatprep.mubr.msk.f32.mxu1 %vm6949_vm0, %v6948_v1 }
0x1240   :  { %v3949_v7 = vpop.permute.xlu0 %3948 }
0x1242   :  { %v6889_v18 = vpop.eup %6888 }
0x1243   :  { %v3714_v14 = vmul.f32 %v6889_v18, %v6881_v57 }
0x1244   :  { %v3708_v2 = vpop.xlane.xlu1 %3707 }
0x1245   :  { %6892 = vrcp.f32 %v3708_v2  ;;  %6645 = vmatmul.mubr.msk.f32.vlgmr.msra.gmra.mxu0 %vm870_vm10, %v3714_v14 }
0x1246   :  { %6653 = vmatpush3.msk.msra.mxu0 %vm874_vm8, %v3949_v7  ;;  %6654 = vmatprep.mubr.msk.f32.mxu0 %vm6949_vm0, %v6948_v1 }
0x1247   :  { %6662 = vmatprep.subr.mxu0 %v6948_v1 }
0x1248   :  { %v3872_v10 = vpop.permute.xlu1 %3871 }
0x1249   :  { %6648 = vmatpush3.msk.msra.mxu1 %vm874_vm8, %v3872_v10 }
0x124a   :  { %v6891_v45 = vpop.eup %6890  ;;  %6657 = vmatprep.subr.mxu1 %v6948_v1 }
0x124b   :  { %v3715_v23 = vmul.f32 %v6891_v45, %v6883_v33 }
0x124d   :  { %6650 = vmatmul.mubr.msk.f32.vlgmr.msra.gmra.mxu1 %vm870_vm10, %v3715_v23 }
0x124e   :  { %6659 = vmatprep.mubr.msk.f32.mxu1 %vm6949_vm0, %v6948_v1  ;;  %6658 = vmatpush3.msra.mxu1 %v7858_v51 }
0x124f   :  { %6667 = vmatprep.subr.mxu1 %v6948_v1 }
0x1252   :  { %v6893_v27 = vpop.eup %6892 }
0x1253   :  { %v3716_v38 = vmul.f32 %v6893_v27, %v6885_v42 }
0x1255   :  { %6655 = vmatmul.mubr.msk.f32.vlgmr.msra.gmra.mxu0 %vm870_vm10, %v3716_v38 }
0x1256   :  { %6664 = vmatprep.mubr.msk.f32.mxu0 %vm6949_vm0, %v6948_v1  ;;  %6663 = vmatpush3.msra.mxu0 %v7866_v3 }
0x1257   :  { %6672 = vmatprep.subr.mxu0 %v6948_v1 }
0x1279   :  { %v2994_v47 = vpop.xlane.xlu1 %2993 }
0x127a   :  { %v2996_v49 = vmul.f32 0.03125, %v2994_v47 }
0x127c   :  { %v2998_v50 = vsub.f32 %v7834_v59, %v2996_v49 }
0x127e   :  { %v3000_v19 = vmul.f32 %v2998_v50, %v2998_v50 }
0x1280   :  { %v3004_v21 = vsel %vm142_vm9, %v3000_v19, 0.0 }
0x1281   :  { %3005 = vadd.xlane.f32.xlu0 %v3004_v21 }
0x12fd   :  { %v3790_v29 = vpop.f32.mrf.mxu1 }
0x12fe   :  { %6660 = vmatmul.mubr.msk.f32.vlgmr.msra.gmra.mxu1 %vm513_vm6, %v3790_v29 }
0x12ff   :  { %v6641_v57 = vpop.f32.mrf.mxu1  ;;  %6668 = vmatpush3.msra.mxu1 %v7873_v17  ;;  %6669 = vmatprep.mubr.msk.f32.mxu1 %vm6949_vm0, %v6948_v1 }
0x1300   :  { %6677 = vmatprep.subr.mxu1 %v6948_v1 }
0x1305   :  { %v3867_v31 = vpop.f32.mrf.mxu0 }
0x1306   :  { %6665 = vmatmul.mubr.msk.f32.vlgmr.msra.gmra.mxu0 %vm513_vm6, %v3867_v31 }
0x1307   :  { %v6646_v32 = vpop.f32.mrf.mxu0  ;;  %6673 = vmatpush3.msra.mxu0 %v7883_v30  ;;  %6674 = vmatprep.mubr.msk.f32.mxu0 %vm6949_vm0, %v6948_v1 }
0x1308   :  { %6688 = vmatprep.subr.mxu0 %v6948_v1 }
0x130a   :  { %v3006_v33 = vpop.xlane.xlu0 %3005 }
0x130b   :  { %v3008_v39 = vmul.f32 0.03125, %v3006_v33 }
0x130d   :  { %v3010_v42 = vadd.f32 1e-12, %v3008_v39  ;;  %v3944_v54 = vpop.f32.mrf.mxu1 }
0x130e   :  { %6670 = vmatmul.mubr.msk.f32.vlgmr.msra.gmra.mxu1 %vm513_vm6, %v3944_v54 }
0x130f   :  { %6894 = vrsqrt.f32 %v3010_v42  ;;  %v6651_v61 = vpop.f32.mrf.mxu1  ;;  %6678 = vmatpush3.msra.mxu1 %v7616_v46  ;;  %6685 = vmatprep.mubr.msk.f32.mxu1 %vm6949_vm0, %v6948_v1 }
0x1310   :  { %6679 = vmatprep.subr.mxu1 %v6948_v1 }
0x1311   :  { %6680 = vmatpush3.msra.mxu1 %v7623_v60 }
0x1312   :  { %6681 = vmatprep.subr.mxu1 %v6948_v1 }
0x1313   :  { %6682 = vmatpush3.msra.mxu1 %v7628_v53 }
0x1314   :  { %6683 = vmatprep.subr.mxu1 %v6948_v1 }
0x1315   :  { %v4021_v52 = vpop.f32.mrf.mxu0  ;;  %6684 = vmatpush3.msra.mxu1 %v7635_v0 }
0x1316   :  { %6675 = vmatmul.mubr.msk.f32.vlgmr.msra.gmra.mxu0 %vm513_vm6, %v4021_v52  ;;  %6699 = vmatprep.subr.mxu1 %v6948_v1 }
0x1317   :  { %v6656_v46 = vpop.f32.mrf.mxu0  ;;  %6689 = vmatpush3.msra.mxu0 %v7663_v36  ;;  %6696 = vmatprep.mubr.msk.f32.mxu0 %vm6949_vm0, %v6948_v1 }
0x1318   :  { %6690 = vmatprep.subr.mxu0 %v6948_v1 }
0x1319   :  { %6691 = vmatpush3.msra.mxu0 %v7670_v35 }
0x131a   :  { %6692 = vmatprep.subr.mxu0 %v6948_v1 }
0x131b   :  { %6693 = vmatpush3.msra.mxu0 %v7679_v37 }
0x131c   :  { %v6895_v60 = vpop.eup %6894  ;;  %6694 = vmatprep.subr.mxu0 %v6948_v1 }
0x131d   :  { %6695 = vmatpush3.msra.mxu0 %v7686_v12  ;;  %v3014_v53 = vmul.f32 %v6895_v60, %v2998_v50 }
0x131e   :  { %6710 = vmatprep.subr.mxu0 %v6948_v1 }
0x131f   :  { %v3020_v0 = vmul.f32 %v7649_v63, %v3014_v53 }
0x1321   :  { %v3026_v36 = vadd.f32 %v7654_v8, %v3020_v0 }
0x1323   :  { %v4333_v62 = vrot.slane %v3026_v36, 5 }
0x1325   :  { %v4334_v35 = vsel %vm1486_vm11, %v4332_v43, %v4333_v62 }
0x1326   :  { %6686 = vmatmul.mubr.msk.f32.vlgmr.msra.gmra.mxu1 %vm138_vm5, %v4334_v35  ;;  %6697 = vmatmul.mubr.msk.f32.vlgmr.msra.gmra.mxu0 %vm138_vm5, %v4334_v35 }
0x1327   :  { %6700 = vmatpush3.msra.mxu1 %v7693_v9  ;;  %6711 = vmatpush3.msra.mxu0 %v7725_v26 }
0x1328   :  { %6701 = vmatprep.subr.mxu1 %v6948_v1  ;;  %6712 = vmatprep.subr.mxu0 %v6948_v1 }
0x1329   :  { %6702 = vmatpush3.msra.mxu1 %v7702_v22  ;;  %6713 = vmatpush3.msra.mxu0 %v7734_v28 }
0x132a   :  { %6703 = vmatprep.subr.mxu1 %v6948_v1  ;;  %6714 = vmatprep.subr.mxu0 %v6948_v1 }
0x132b   :  { %6704 = vmatpush3.msra.mxu1 %v7711_v56  ;;  %6715 = vmatpush3.msra.mxu0 %v7743_v44 }
0x132c   :  { %6705 = vmatprep.subr.mxu1 %v6948_v1  ;;  %6716 = vmatprep.subr.mxu0 %v6948_v1 }
0x132d   :  { %6706 = vmatpush3.msra.mxu1 %v7718_v24  ;;  %6707 = vmatprep.mubr.msk.f32.mxu1 %vm6949_vm0, %v6948_v1 }
0x132e   :  { %6717 = vmatpush3.msra.mxu0 %v7750_v13  ;;  %6718 = vmatprep.mubr.msk.f32.mxu0 %vm6949_vm0, %v6948_v1  ;;  %v7950_v13 = vrot.slane %v7644_v6, %v1480_v48 }
0x132f   :  { %6708 = vmatmul.mubr.msk.f32.vlgmr.msra.gmra.mxu1 %vm138_vm5, %v4334_v35  ;;  %6719 = vmatmul.mubr.msk.f32.vlgmr.msra.gmra.mxu0 %vm138_vm5, %v4334_v35 }
0x1330   :  { %6726 = vmatprep.subr.mxu0 %v6948_v1  ;;  %6721 = vmatprep.subr.mxu1 %v6948_v1 }
0x1331   :  { %6723 = vmatprep.mubr.msk.f32.mxu1 %vm6949_vm0, %v6948_v1  ;;  %6728 = vmatprep.mubr.msk.f32.mxu0 %vm6949_vm0, %v6948_v1 }
0x13be   :  { %v4094_v63 = vpop.f32.mrf.mxu1 }
0x13bf   :  { %v4317_v56 = vsel %vm1470_vm12, %v4094_v63, 0.0 }
0x13c0   :  { %v6661_v8 = vpop.f32.mrf.mxu1 }
0x13c6   :  { %v4167_v11 = vpop.f32.mrf.mxu0 }
0x13c7   :  { %v4318_v22 = vsel %vm1470_vm12, %v4167_v11, 0.0 }
0x13c8   :  { %v6666_v37 = vpop.f32.mrf.mxu0  ;;  %v4319_v26 = vadd.f32 %v4318_v22, %v4317_v56 }
0x13ce   :  { %v4240_v12 = vpop.f32.mrf.mxu1 }
0x13cf   :  { %v4320_v24 = vsel %vm1470_vm12, %v4240_v12, 0.0 }
0x13d0   :  { %v6671_v9 = vpop.f32.mrf.mxu1  ;;  %v4321_v28 = vadd.f32 %v4320_v24, %v4319_v26 }
0x13d6   :  { %v4313_v44 = vpop.f32.mrf.mxu0 }
0x13d7   :  { %v4322_v4 = vsel %vm1470_vm12, %v4313_v44, 0.0 }
0x13d8   :  { %v4323_v5 = vadd.f32 %v4322_v4, %v4321_v28  ;;  %v6676_v18 = vpop.f32.mrf.mxu0 }
0x13da   :  { %v4328_v14 = vadd.f32 %v7950_v13, %v4323_v5 }
0x13dc   :  { %v4329_v2 = vadd.f32 %v4328_v14, %v7607_v40 }
0x13de   :  { %4330 = vst.msk [vmem:[#allocation2] sm:$0x1f] %vm1470_vm12, %v4329_v2 }
0x13e6   :  { %v4403_v7 = vpop.f32.mrf.mxu1  ;;  %v4473_v10 = vpop.f32.mrf.mxu0 }
0x13e7   :  { %v4404_v45 = vadd.f32 %v7763_v16, %v4403_v7  ;;  %v4474_v23 = vadd.f32 %v7770_v25, %v4473_v10 }
0x13e8   :  { %v6687_v27 = vpop.f32.mrf.mxu1  ;;  %v6698_v38 = vpop.f32.mrf.mxu0 }
0x13e9   :  { %4695 = vrot.lane.b32.xlu1 %v4474_v23, %s6950_s12  ;;  %4618 = vrot.lane.b32.xlu0 %v4404_v45, %s6950_s12 }
0x13ef   :  { %v4543_v48 = vpop.f32.mrf.mxu1  ;;  %v4613_v47 = vpop.f32.mrf.mxu0 }
0x13f0   :  { %v7961_v49 = vadd.f32 %v7777_v41, %v4543_v48  ;;  %v7964_v50 = vadd.f32 %v7787_v15, %v4613_v47 }
0x13f1   :  { %v6709_v19 = vpop.f32.mrf.mxu1  ;;  %v6720_v21 = vpop.f32.mrf.mxu0 }
0x13f2   :  { %4849 = vrot.lane.b32.xlu0 %v7964_v50, %s6950_s12  ;;  %4772 = vrot.lane.b32.xlu1 %v7961_v49, %s6950_s12 }
0x145b   :  { %v4696_v16 = vpop.permute.xlu1 %4695  ;;  %v4619_v25 = vpop.permute.xlu0 %4618 }
0x145c   :  { %6722 = vmatpush3.xpose.msk.msra.mxu1 %vm513_vm6, %v4619_v25  ;;  %6727 = vmatpush3.xpose.msk.msra.mxu0 %vm513_vm6, %v4696_v16 }
0x145d   :  { %6731 = vmatprep.subr.mxu1 %v6948_v1  ;;  %6736 = vmatprep.subr.mxu0 %v6948_v1 }
0x145f   :  { %6724 = vmatmul.mubr.msk.f32.vlgmr.msra.gmra.mxu1 %vm513_vm6, %v4404_v45  ;;  %6729 = vmatmul.mubr.msk.f32.vlgmr.msra.gmra.mxu0 %vm513_vm6, %v4474_v23 }
0x1460   :  { %6733 = vmatprep.mubr.msk.f32.mxu1 %vm6949_vm0, %v6948_v1  ;;  %6738 = vmatprep.mubr.msk.f32.mxu0 %vm6949_vm0, %v6948_v1 }
0x1464   :  { %v4850_v41 = vpop.permute.xlu0 %4849  ;;  %v4773_v15 = vpop.permute.xlu1 %4772 }
0x1465   :  { %6732 = vmatpush3.xpose.msk.msra.mxu1 %vm513_vm6, %v4773_v15  ;;  %6737 = vmatpush3.xpose.msk.msra.mxu0 %vm513_vm6, %v4850_v41 }
0x1466   :  { %6741 = vmatprep.subr.mxu1 %v6948_v1  ;;  %6746 = vmatprep.subr.mxu0 %v6948_v1 }
0x1468   :  { %6734 = vmatmul.mubr.msk.f32.vlgmr.msra.gmra.mxu1 %vm513_vm6, %v7961_v49  ;;  %6739 = vmatmul.mubr.msk.f32.vlgmr.msra.gmra.mxu0 %vm513_vm6, %v7964_v50 }
0x1469   :  { %6743 = vmatprep.mubr.msk.f32.mxu1 %vm6949_vm0, %v6948_v1  ;;  %6748 = vmatprep.mubr.msk.f32.mxu0 %vm6949_vm0, %v6948_v1 }
0x151f   :  { %v4690_v29 = vpop.f32.mrf.mxu1  ;;  %v4767_v57 = vpop.f32.mrf.mxu0 }
0x1520   :  { %v4925_v31 = vmul.f32 0.35355338, %v4690_v29  ;;  %v4926_v32 = vmul.f32 0.35355338, %v4767_v57 }
0x1521   :  { %v6725_v33 = vpop.f32.mrf.mxu1  ;;  %v6730_v39 = vpop.f32.mrf.mxu0 }
0x1522   :  { %v4932_v42 = vsel %vm823_vm7, %v4926_v32, -inf  ;;  %v4929_v54 = vsel %vm823_vm7, %v4925_v31, -inf }
0x1523   :  { %4933 = vmax.xlane.f32.xlu0 %v4932_v42  ;;  %4930 = vmax.xlane.f32.xlu1 %v4929_v54 }
0x1528   :  { %v4844_v61 = vpop.f32.mrf.mxu1  ;;  %v4921_v52 = vpop.f32.mrf.mxu0 }
0x1529   :  { %v4927_v46 = vmul.f32 0.35355338, %v4844_v61  ;;  %v4928_v60 = vmul.f32 0.35355338, %v4921_v52 }
0x152a   :  { %v6735_v53 = vpop.f32.mrf.mxu1  ;;  %v6740_v0 = vpop.f32.mrf.mxu0 }
0x152b   :  { %v4938_v36 = vsel %vm823_vm7, %v4928_v60, -inf  ;;  %v4935_v43 = vsel %vm823_vm7, %v4927_v46, -inf }
0x152c   :  { %4939 = vmax.xlane.f32.xlu1 %v4938_v36  ;;  %4936 = vmax.xlane.f32.xlu0 %v4935_v43 }
0x153d   :  { %5050 = vrot.lane.b32.xlu1 %v4474_v23, %s6951_s15 }
0x1542   :  { %4973 = vrot.lane.b32.xlu0 %v4404_v45, %s6951_s15 }
0x15ac   :  { %v4934_v62 = vpop.xlane.xlu0 %4933  ;;  %v4931_v35 = vpop.xlane.xlu1 %4930 }
0x15ad   :  { %v4942_v63 = vsub.f32 %v4926_v32, %v4934_v62  ;;  %v4941_v8 = vsub.f32 %v4925_v31, %v4931_v35 }
0x15af   :  { %v4947_v11 = vmul.f32 1.442695, %v4942_v63  ;;  %v4945_v37 = vmul.f32 1.442695, %v4941_v8 }
0x15b1   :  { %6896 = vpow2.f32 %v4947_v11 }
0x15b2   :  { %6898 = vpow2.f32 %v4945_v37 }
0x15b5   :  { %v4940_v12 = vpop.xlane.xlu1 %4939  ;;  %v4937_v9 = vpop.xlane.xlu0 %4936 }
0x15b6   :  { %v4944_v22 = vsub.f32 %v4928_v60, %v4940_v12  ;;  %v4943_v56 = vsub.f32 %v4927_v46, %v4937_v9 }
0x15b8   :  { %v4951_v24 = vmul.f32 1.442695, %v4944_v22  ;;  %v4949_v26 = vmul.f32 1.442695, %v4943_v56 }
0x15b9   :  { %v5051_v28 = vpop.permute.xlu1 %5050  ;;  %v4974_v44 = vpop.permute.xlu0 %4973 }
0x15ba   :  { %6900 = vpow2.f32 %v4951_v24  ;;  %6742 = vmatpush3.msk.msra.mxu1 %vm874_vm8, %v4974_v44  ;;  %6747 = vmatpush3.msk.msra.mxu0 %vm874_vm8, %v5051_v28 }
0x15bb   :  { %6902 = vpow2.f32 %v4949_v26  ;;  %6751 = vmatprep.subr.mxu1 %v6948_v1  ;;  %6756 = vmatprep.subr.mxu0 %v6948_v1 }
0x15be   :  { %v6897_v4 = vpop.eup %6896 }
0x15bf   :  { %v6899_v5 = vpop.eup %6898  ;;  %v4956_v18 = vsel %vm823_vm7, %v6897_v4, 0.0 }
0x15c0   :  { %4957 = vadd.xlane.f32.xlu1 %v4956_v18  ;;  %v4953_v14 = vsel %vm823_vm7, %v6899_v5, 0.0 }
0x15c1   :  { %4954 = vadd.xlane.f32.xlu0 %v4953_v14 }
0x15c7   :  { %v6901_v2 = vpop.eup %6900 }
0x15c8   :  { %v6903_v7 = vpop.eup %6902  ;;  %v4962_v10 = vsel %vm823_vm7, %v6901_v2, 0.0 }
0x15c9   :  { %4963 = vadd.xlane.f32.xlu1 %v4962_v10  ;;  %v4959_v45 = vsel %vm823_vm7, %v6903_v7, 0.0  ;;  %v6048_v10 = vld [vmem:[%s8166_s7 + $0x28] sm:$0xff] }
0x15ca   :  { %4960 = vadd.xlane.f32.xlu0 %v4959_v45  ;;  %v6047_v45 = vld [vmem:[%s8166_s7 + $0x20] sm:$0xff] }
0x15da   :  { %5127 = vrot.lane.b32.xlu1 %v7961_v49, %s6951_s15 }
0x15e0   :  { %5204 = vrot.lane.b32.xlu0 %v7964_v50, %s6951_s15 }
0x1649   :  { %v4958_v23 = vpop.xlane.xlu1 %4957 }
0x164a   :  { %6904 = vrcp.f32 %v4958_v23  ;;  %v4955_v27 = vpop.xlane.xlu0 %4954  ;;  %v6070_v23 = vld [vmem:[%s8168_s9 + $0xf8] sm:$0xff] }
0x164b   :  { %6906 = vrcp.f32 %v4955_v27  ;;  %v6069_v27 = vld [vmem:[%s8168_s9 + $0xf0] sm:$0xff] }
0x1652   :  { %v4964_v38 = vpop.xlane.xlu1 %4963 }
0x1653   :  { %6908 = vrcp.f32 %v4964_v38  ;;  %v4961_v48 = vpop.xlane.xlu0 %4960  ;;  %v6068_v38 = vld [vmem:[%s8168_s9 + $0xe8] sm:$0xff] }
0x1654   :  { %6910 = vrcp.f32 %v4961_v48 }
0x1656   :  { %v5128_v41 = vpop.permute.xlu1 %5127 }
0x1657   :  { %v6905_v47 = vpop.eup %6904  ;;  %v5205_v25 = vpop.permute.xlu0 %5204 }
0x1658   :  { %v6907_v19 = vpop.eup %6906  ;;  %v4970_v21 = vmul.f32 %v6905_v47, %v6897_v4 }
0x1659   :  { %v4969_v16 = vmul.f32 %v6907_v19, %v6899_v5 }
0x165a   :  { %6749 = vmatmul.mubr.msk.f32.vlgmr.msra.gmra.mxu0 %vm870_vm10, %v4970_v21 }
0x165b   :  { %6744 = vmatmul.mubr.msk.f32.vlgmr.msra.gmra.mxu1 %vm870_vm10, %v4969_v16  ;;  %6757 = vmatpush3.msk.msra.mxu0 %vm874_vm8, %v5205_v25 }
0x165c   :  { %6752 = vmatpush3.msk.msra.mxu1 %vm874_vm8, %v5128_v41  ;;  %6753 = vmatprep.mubr.msk.f32.mxu1 %vm6949_vm0, %v6948_v1  ;;  %v5619_v41 = vrot.slane %v7644_v6, %v2774_v55  ;;  %v6067_v55 = vld [vmem:[%s8168_s9 + $0xe0] sm:$0xff] }
0x165d   :  { %6758 = vmatprep.mubr.msk.f32.mxu0 %vm6949_vm0, %v6948_v1  ;;  %6761 = vmatprep.subr.mxu1 %v6948_v1 }
0x165e   :  { %6766 = vmatprep.subr.mxu0 %v6948_v1 }
0x1660   :  { %v6909_v49 = vpop.eup %6908 }
0x1661   :  { %v6911_v50 = vpop.eup %6910  ;;  %v4972_v15 = vmul.f32 %v6909_v49, %v6901_v2  ;;  %v6050_v2 = vld [vmem:[%s8166_s7 + $0x38] sm:$0xff] }
0x1662   :  { %v4971_v29 = vmul.f32 %v6911_v50, %v6903_v7  ;;  %v6049_v7 = vld [vmem:[%s8166_s7 + $0x30] sm:$0xff] }
0x1663   :  { %6759 = vmatmul.mubr.msk.f32.vlgmr.msra.gmra.mxu0 %vm870_vm10, %v4972_v15 }
0x1664   :  { %6754 = vmatmul.mubr.msk.f32.vlgmr.msra.gmra.mxu1 %vm870_vm10, %v4971_v29  ;;  %6767 = vmatpush3.msra.mxu0 %v7866_v3  ;;  %v5625_v29 = vrot.slane %v7644_v6, %v2780_v58  ;;  %v6065_v58 = vld [vmem:[%s8168_s9 + $0xd0] sm:$0xff]  ;;  %v6064_v6 = vld [vmem:[%s8168_s9 + $0xc8] sm:$0xff] }
0x1665   :  { %6762 = vmatpush3.msra.mxu1 %v7858_v51  ;;  %6763 = vmatprep.mubr.msk.f32.mxu1 %vm6949_vm0, %v6948_v1 }
0x1666   :  { %6768 = vmatprep.mubr.msk.f32.mxu0 %vm6949_vm0, %v6948_v1  ;;  %6771 = vmatprep.subr.mxu1 %v6948_v1 }
0x1667   :  { %6776 = vmatprep.subr.mxu0 %v6948_v1 }
0x171a   :  { %v5123_v57 = vpop.f32.mrf.mxu0 }
0x171b   :  { %v5046_v31 = vpop.f32.mrf.mxu1  ;;  %6769 = vmatmul.mubr.msk.f32.vlgmr.msra.gmra.mxu0 %vm513_vm6, %v5123_v57 }
0x171c   :  { %6764 = vmatmul.mubr.msk.f32.vlgmr.msra.gmra.mxu1 %vm513_vm6, %v5046_v31  ;;  %v6750_v32 = vpop.f32.mrf.mxu0  ;;  %6777 = vmatpush3.msra.mxu0 %v7883_v30 }
0x171d   :  { %v6745_v51 = vpop.f32.mrf.mxu1  ;;  %6772 = vmatpush3.msra.mxu1 %v7873_v17  ;;  %6773 = vmatprep.mubr.msk.f32.mxu1 %vm6949_vm0, %v6948_v1 }
0x171e   :  { %6778 = vmatprep.mubr.msk.f32.mxu0 %vm6949_vm0, %v6948_v1  ;;  %6781 = vmatprep.subr.mxu1 %v6050_v2 }
0x171f   :  { %6792 = vmatprep.subr.mxu0 %v6070_v23 }
0x1723   :  { %v5277_v3 = vpop.f32.mrf.mxu0 }
0x1724   :  { %v5200_v33 = vpop.f32.mrf.mxu1  ;;  %6779 = vmatmul.mubr.msk.f32.vlgmr.msra.gmra.mxu0 %vm513_vm6, %v5277_v3 }
0x1725   :  { %6774 = vmatmul.mubr.msk.f32.vlgmr.msra.gmra.mxu1 %vm513_vm6, %v5200_v33  ;;  %v6760_v39 = vpop.f32.mrf.mxu0  ;;  %6793 = vmatpush3.msra.mxu0 %v6070_v23  ;;  %v6066_v33 = vld [vmem:[%s8168_s9 + $0xd8] sm:$0xff] }
0x1726   :  { %v6755_v42 = vpop.f32.mrf.mxu1  ;;  %6782 = vmatpush3.msra.mxu1 %v6050_v2  ;;  %6794 = vmatprep.subr.mxu0 %v6069_v27  ;;  %v6063_v39 = vld [vmem:[%s8168_s9 + $0xc0] sm:$0xff] }
0x1727   :  { %6783 = vmatprep.subr.mxu1 %v6049_v7  ;;  %6795 = vmatpush3.msra.mxu0 %v6069_v27  ;;  %v6062_v42 = vld [vmem:[%s8168_s9 + $0xb8] sm:$0xff] }
0x1728   :  { %6784 = vmatpush3.msra.mxu1 %v6049_v7  ;;  %6796 = vmatprep.subr.mxu0 %v6068_v38 }
0x1729   :  { %6785 = vmatprep.subr.mxu1 %v6048_v10  ;;  %6797 = vmatpush3.msra.mxu0 %v6068_v38 }
0x172a   :  { %6786 = vmatpush3.msra.mxu1 %v6048_v10  ;;  %6798 = vmatprep.subr.mxu0 %v6067_v55 }
0x172b   :  { %6787 = vmatprep.subr.mxu1 %v6047_v45  ;;  %6799 = vmatpush3.msra.mxu0 %v6067_v55 }
0x172c   :  { %6788 = vmatpush3.msra.mxu1 %v6047_v45  ;;  %6800 = vmatprep.subr.mxu0 %v6066_v33 }
0x172d   :  { %6801 = vmatpush3.msra.mxu0 %v6066_v33 }
0x172e   :  { %6802 = vmatprep.subr.mxu0 %v6065_v58 }
0x172f   :  { %6803 = vmatpush3.msra.mxu0 %v6065_v58 }
0x1730   :  { %6804 = vmatprep.subr.mxu0 %v6064_v6 }
0x1731   :  { %6805 = vmatpush3.msra.mxu0 %v6064_v6 }
0x1732   :  { %6806 = vmatprep.subr.mxu0 %v6063_v39 }
0x1733   :  { %6807 = vmatpush3.msra.mxu0 %v6063_v39 }
0x1734   :  { %6808 = vmatprep.subr.mxu0 %v6062_v42 }
0x1735   :  { %6809 = vmatpush3.msra.mxu0 %v6062_v42 }
0x17db   :  { %v5423_v54 = vpop.f32.mrf.mxu0 }
0x17dc   :  { %v5350_v61 = vpop.f32.mrf.mxu1  ;;  %v5574_v46 = vsel %vm1470_vm12, %v5423_v54, 0.0  ;;  %v6061_v54 = vld [vmem:[%s8168_s9 + $0xb0] sm:$0xff] }
0x17dd   :  { %v6770_v30 = vpop.f32.mrf.mxu0  ;;  %v5573_v17 = vsel %vm1470_vm12, %v5350_v61, 0.0  ;;  %6810 = vmatprep.subr.mxu0 %v6061_v54  ;;  %v6060_v61 = vld [vmem:[%s8168_s9 + $0xa8] sm:$0xff] }
0x17de   :  { %v6765_v52 = vpop.f32.mrf.mxu1  ;;  %v5575_v53 = vadd.f32 %v5574_v46, %v5573_v17  ;;  %6811 = vmatpush3.msra.mxu0 %v6061_v54  ;;  %v6059_v30 = vld [vmem:[%s8168_s9 + $0xa0] sm:$0xff]  ;;  %v6057_v17 = vld [vmem:[%s8168_s9 + $0x90] sm:$0xff]  ;;  %v6056_v46 = vld [vmem:[%s8168_s9 + $0x88] sm:$0xff] }
0x17df   :  { %6812 = vmatprep.subr.mxu0 %v6060_v61  ;;  %v6058_v52 = vld [vmem:[%s8168_s9 + $0x98] sm:$0xff] }
0x17e0   :  { %6813 = vmatpush3.msra.mxu0 %v6060_v61 }
0x17e1   :  { %6814 = vmatprep.subr.mxu0 %v6059_v30 }
0x17e2   :  { %6815 = vmatpush3.msra.mxu0 %v6059_v30 }
0x17e3   :  { %6816 = vmatprep.subr.mxu0 %v6058_v52 }
0x17e4   :  { %v5569_v60 = vpop.f32.mrf.mxu0  ;;  %6817 = vmatpush3.msra.mxu0 %v6058_v52 }
0x17e5   :  { %v5496_v0 = vpop.f32.mrf.mxu1  ;;  %v5578_v35 = vsel %vm1470_vm12, %v5569_v60, 0.0  ;;  %6818 = vmatprep.subr.mxu0 %v6057_v17  ;;  %v6055_v60 = vld [vmem:[%s8168_s9 + $0x80] sm:$0xff] }
0x17e6   :  { %v5576_v1 = vsel %vm1470_vm12, %v5496_v0, 0.0  ;;  %v6780_v36 = vpop.f32.mrf.mxu0  ;;  %6819 = vmatpush3.msra.mxu0 %v6057_v17 }
0x17e7   :  { %v5577_v43 = vadd.f32 %v5576_v1, %v5575_v53  ;;  %v6775_v62 = vpop.f32.mrf.mxu1  ;;  %6820 = vmatprep.subr.mxu0 %v6056_v46  ;;  %v6052_v53 = vld [vmem:[%s8167_s8 + $0x1] ss:$0 sm:$0xff] }
0x17e8   :  { %6821 = vmatpush3.msra.mxu0 %v6056_v46 }
0x17e9   :  { %v5579_v63 = vadd.f32 %v5578_v35, %v5577_v43  ;;  %6822 = vmatprep.subr.mxu0 %v6055_v60 }
0x17ea   :  { %6823 = vmatpush3.msra.mxu0 %v6055_v60 }
0x17eb   :  { %v5580_v8 = vadd.f32 %v5579_v63, %v7950_v13 }
0x17ed   :  { %v5582_v11 = vrot.slane %v5580_v8, 3 }
0x17ef   :  { %v5584_v37 = vadd.f32 %v5582_v11, %v7607_v40  ;;  %v5585_v12 = vadd.f32 %v5582_v11, %v7834_v59 }
0x17f1   :  { %5586 = vst.msk [vmem:[#allocation2] sm:$0xe0] %vm2741_vm13, %v5584_v37 }
0x17f2   :  { %5587 = vst.msk [vmem:[#allocation2 + $0x8] sm:$0x3] %vm142_vm9, %v5585_v12 }
0x17f8   :  { %v8051_v22 = vld [vmem:[#allocation2] sm:$0xff] }
0x17f9   :  { %v8049_v9 = vld [vmem:[#allocation2 + $0x8] sm:$0x3]  ;;  %v5590_v24 = vsel %vm138_vm5, %v8051_v22, 0.0 }
0x17fa   :  { %v5593_v56 = vsel %vm142_vm9, %v8049_v9, 0.0  ;;  %5591 = vadd.xlane.f32.xlu1 %v5590_v24 }
0x17fb   :  { %5594 = vadd.xlane.f32.xlu0 %v5593_v56 }
0x1883   :  { %v5592_v40 = vpop.xlane.xlu1 %5591 }
0x1884   :  { %v5595_v13 = vpop.xlane.xlu0 %5594  ;;  %v5596_v59 = vmul.f32 0.03125, %v5592_v40  ;;  %v6925_v40 = vld [vmem:[%s8169_s10 + $0x8] sm:$0x3f] }
0x1885   :  { %v5597_v26 = vmul.f32 0.03125, %v5595_v13 }
0x1886   :  { %v5598_v44 = vsub.f32 %v8051_v22, %v5596_v59 }
0x1887   :  { %v5599_v28 = vsub.f32 %v8049_v9, %v5597_v26  ;;  %v5752_v26 = vrot.slane %v6925_v40, %v2904_v20 }
0x1888   :  { %v5600_v5 = vmul.f32 %v5598_v44, %v5598_v44 }
0x1889   :  { %v5601_v4 = vmul.f32 %v5599_v28, %v5599_v28 }
0x188a   :  { %v5602_v14 = vsel %vm138_vm5, %v5600_v5, 0.0 }
0x188b   :  { %v5605_v18 = vsel %vm142_vm9, %v5601_v4, 0.0  ;;  %5603 = vadd.xlane.f32.xlu0 %v5602_v14 }
0x188c   :  { %5606 = vadd.xlane.f32.xlu1 %v5605_v18 }
0x1914   :  { %v5604_v48 = vpop.xlane.xlu0 %5603 }
0x1915   :  { %v5607_v47 = vpop.xlane.xlu1 %5606  ;;  %v5608_v19 = vmul.f32 0.03125, %v5604_v48 }
0x1916   :  { %v5609_v21 = vmul.f32 0.03125, %v5607_v47 }
0x1917   :  { %v5610_v16 = vadd.f32 1e-12, %v5608_v19 }
0x1918   :  { %v5611_v25 = vadd.f32 1e-12, %v5609_v21 }
0x1919   :  { %6912 = vrsqrt.f32 %v5610_v16 }
0x191a   :  { %6914 = vrsqrt.f32 %v5611_v25 }
0x1926   :  { %v6913_v49 = vpop.eup %6912 }
0x1927   :  { %v6915_v50 = vpop.eup %6914  ;;  %v5614_v15 = vmul.f32 %v6913_v49, %v5598_v44 }
0x1928   :  { %v5615_v57 = vmul.f32 %v6915_v50, %v5599_v28 }
0x1929   :  { %v5620_v31 = vmul.f32 %v5619_v41, %v5614_v15  ;;  %v6071_v15 = vld [vmem:[%s8162_s3 + $0x2] ss:$0 sm:$0xff] }
0x192a   :  { %v5621_v32 = vmul.f32 %v5619_v41, %v5615_v57 }
0x192b   :  { %v5626_v51 = vadd.f32 %v5625_v29, %v5620_v31  ;;  %v6072_v31 = vld [vmem:[%s8162_s3 + $0x3] ss:$0 sm:$0xff]  ;;  %s6952_s3 = smov [#allocation3]  }
0x192c   :  { %v5627_v3 = vadd.f32 %v5625_v29, %v5621_v32  ;;  %s5905_s28 = sshll.u32 %s6952_s3, 4  ;;  %s5906_s28 = int_to_ptr.vmem [resolvable:$true] %s5905_s28 }
0x192d   :  { %6789 = vmatprep.mubr.msk.f32.mxu1 %vm138_vm5, %v5626_v51  ;;  %s6926_s29 = scalar_lea.vmem %s5906_s28, 32  ;;  %p6931_p1 = scmp.lt.s32.totalorder %s5906_s28, %s5906_s28 }
0x192e   :  { %6790 = vmatmul.mubr.msk.f32.vlgmr.msra.gmra.mxu1 %vm138_vm5, %v5627_v3  ;;  %p6927_p0 = scmp.ne.s32.totalorder %s5906_s28, %s6926_s29  ;;  %p6932_p2 = scmp.lt.s32.totalorder %s6926_s29, %s6926_s29 }
0x1930   :  { %p6933_p3 = por %p6932_p2, %p6931_p1 }
0x1932   :  { %p6934_p4 = pnand %p6933_p3, %p6927_p0 }
0x19ee   :  { %v6791_v0 = vpop.f32.mrf.mxu1 }
0x19ef   :  { %v5719_v1 = vadd.f32 %v6791_v0, %v6052_v53 }
0x19f0   :  { %v5713_v36 = vpop.f32.mrf.mxu1 }
0x19f1   :  { %v5725_v43 = vmul.f32 0.70710677, %v5719_v1  ;;  %v5714_v62 = vadd.f32 %v6052_v53, %v5713_v36  ;;  %v5723_v56 = vmul.f32 0.5, %v5719_v1 }
0x19f3   :  { %6916 = verf.f32 %v5725_v43  ;;  %v5724_v35 = vmul.f32 0.70710677, %v5714_v62  ;;  %v5722_v37 = vmul.f32 0.5, %v5714_v62 }
0x19f5   :  { %6918 = verf.f32 %v5724_v35 }
0x1a00   :  { %v6917_v63 = vpop.eup %6916 }
0x1a01   :  { %v5729_v11 = vadd.f32 1.0, %v6917_v63 }
0x1a02   :  { %v6919_v8 = vpop.eup %6918 }
0x1a03   :  { %v5728_v12 = vadd.f32 1.0, %v6919_v8  ;;  %v5731_v13 = vmul.f32 %v5729_v11, %v5723_v56 }
0x1a05   :  { %v5730_v24 = vmul.f32 %v5728_v12, %v5722_v37 }
0x1a07   :  { %6824 = vmatprep.mubr.f32.mxu0 %v5730_v24 }
0x1a08   :  { %6825 = vmatmul.mubr.f32.vlgmr.msra.gmra.mxu0 %v5731_v13 }
0x1ac8   :  { %v6826_v59 = vpop.f32.mrf.mxu0 }
0x1ac9   :  { %v5825_v28 = vadd.f32 %v6826_v59, %v5752_v26 }
0x1aca   :  { %v5819_v44 = vpop.f32.mrf.mxu0 }
0x1acb   :  { %v5829_v4 = vadd.f32 %v5825_v28, %v8049_v9  ;;  %v5820_v5 = vadd.f32 %v5819_v44, %v5752_v26 }
0x1acd   :  { %5831 = vst.msk [vmem:[#allocation2 + $0x8] sm:$0x3] %vm142_vm9, %v5829_v4  ;;  %v5828_v18 = vadd.f32 %v5820_v5, %v8051_v22 }
0x1acf   :  { %5830 = vst.msk [vmem:[#allocation2] sm:$0xff] %vm138_vm5, %v5828_v18 }
0x1ad4   :  { %v5833_v14 = vld [vmem:[#allocation2 + $0x8] sm:$0x3] }
0x1ad5   :  { %v5839_v2 = vsel %vm142_vm9, %v5833_v14, 0.0 }
0x1ad6   :  { %5840 = vadd.xlane.f32.xlu1 %v5839_v2  ;;  %v5832_v7 = vld [vmem:[#allocation2] sm:$0xff] }
0x1ad7   :  { %v5836_v34 = vsel %vm138_vm5, %v5832_v7, 0.0 }
0x1ad8   :  { %5837 = vadd.xlane.f32.xlu0 %v5836_v34 }
0x1b5f   :  { %v5841_v20 = vpop.xlane.xlu1 %5840 }
0x1b60   :  { %v5843_v10 = vmul.f32 0.03125, %v5841_v20 }
0x1b61   :  { %v5838_v45 = vpop.xlane.xlu0 %5837 }
0x1b62   :  { %v5845_v23 = vsub.f32 %v5833_v14, %v5843_v10  ;;  %v5842_v9 = vmul.f32 0.03125, %v5838_v45 }
0x1b64   :  { %v5844_v27 = vsub.f32 %v5832_v7, %v5842_v9  ;;  %v5847_v38 = vmul.f32 %v5845_v23, %v5845_v23 }
0x1b66   :  { %v5851_v48 = vsel %vm142_vm9, %v5847_v38, 0.0  ;;  %v5846_v22 = vmul.f32 %v5844_v27, %v5844_v27 }
0x1b67   :  { %5852 = vadd.xlane.f32.xlu1 %v5851_v48 }
0x1b68   :  { %v5848_v47 = vsel %vm138_vm5, %v5846_v22, 0.0 }
0x1b69   :  { %5849 = vadd.xlane.f32.xlu0 %v5848_v47 }
0x1bf0   :  { %v5853_v19 = vpop.xlane.xlu1 %5852 }
0x1bf1   :  { %v5855_v21 = vmul.f32 0.03125, %v5853_v19 }
0x1bf2   :  { %v5850_v16 = vpop.xlane.xlu0 %5849 }
0x1bf3   :  { %v5857_v25 = vadd.f32 1e-12, %v5855_v21  ;;  %v5854_v41 = vmul.f32 0.03125, %v5850_v16 }
0x1bf5   :  { %6920 = vrsqrt.f32 %v5857_v25  ;;  %v5856_v49 = vadd.f32 1e-12, %v5854_v41 }
0x1bf7   :  { %6922 = vrsqrt.f32 %v5856_v49 }
0x1c02   :  { %v6921_v50 = vpop.eup %6920 }
0x1c03   :  { %v5861_v29 = vmul.f32 %v6921_v50, %v5845_v23 }
0x1c04   :  { %v6923_v57 = vpop.eup %6922 }
0x1c05   :  { %v5860_v32 = vmul.f32 %v6923_v57, %v5844_v27  ;;  %v5867_v51 = vmul.f32 %v6071_v15, %v5861_v29 }
0x1c07   :  { %v5866_v3 = vmul.f32 %v6071_v15, %v5860_v32  ;;  %v5873_v55 = vadd.f32 %v6072_v31, %v5867_v51 }
0x1c09   :  { %v5872_v33 = vadd.f32 %v6072_v31, %v5866_v3  ;;  %v5887_v39 = vrot.slane %v5873_v55, 5 }
0x1c0b   :  { %v5874_v58 = vsel %vm1470_vm12, %v5872_v33, 0.0  ;;  %v5886_v6 = vrot.slane %v5872_v33, 5 }
0x1c0c   :  { %v5875_v42 = vrot.slane %v5874_v58, 4 }
0x1c0d   :  { %v5888_v54 = vsel %vm1486_vm11, %v5886_v6, %v5887_v39 }
0x1c0e   :  { %v5876_v61 = vadd.f32 %v5875_v42, %v5874_v58  ;;  %v5890_v30 = vsel %vm1470_vm12, %v5888_v54, 0.0 }
0x1c0f   :  { %v5891_v52 = vrot.slane %v5890_v30, 4 }
0x1c10   :  { %v5877_v17 = vrot.slane %v5876_v61, 2 }
0x1c11   :  { %v5892_v46 = vadd.f32 %v5891_v52, %v5890_v30 }
0x1c12   :  { %v5878_v60 = vadd.f32 %v5877_v17, %v5876_v61 }
0x1c13   :  { %v5893_v53 = vrot.slane %v5892_v46, 2 }
0x1c14   :  { %v5879_v0 = vrot.slane %v5878_v60, 1 }
0x1c15   :  { %v5894_v1 = vadd.f32 %v5893_v53, %v5892_v46 }
0x1c16   :  { %v5880_v36 = vadd.f32 %v5879_v0, %v5878_v60 }
0x1c17   :  { %v5895_v43 = vrot.slane %v5894_v1, 1 }
0x1c18   :  { %v5882_v62 = vmul.f32 0.2, %v5880_v36 }
0x1c19   :  { %v5896_v35 = vadd.f32 %v5895_v43, %v5894_v1 }
0x1c1a   :  { %5883 = vst.msk [vmem:[#allocation3] sm:$0x1] %vm128_vm2, %v5882_v62 }
0x1c1b   :  { %v5897_v63 = vmul.f32 0.2, %v5896_v35 }
0x1c1d   :  { %5898 = vst.msk [vmem:[#allocation3 + $0x1] sm:$0x1] %vm128_vm2, %v5897_v63 }
0x1c1e   :  { %6937 = shalt.err (!%p6934_p4)
}
0x1c1f   :  { %5908 = dma.vmem_to_hbm [thread:$0]  %s5906_s28, 32, %s8170_s11, [#allocation4]  }
0x1c20   :  { %6946 = dma.done.wait [#allocation4], 32  }
0x1c21   :  { %6947 = vsyncadd [#allocation4], 4294967264 }
0x1c22   :  { %5912 = vsyncpa [#allocation4], 1 }

</bundles_post_ra>
